<compile_context>
chip_gen: v6e
topology: v6e:2x2x1
jax: 0.10.0
libtpu: 0.0.40
codegen_flags: <defaults>
</compile_context>

<pallas_src>
import math

import jax
import jax.numpy as jnp
import numpy as np
from jax import lax
from jax.experimental import pallas as pl
from jax.experimental.pallas import tpu as pltpu


# ----------------------------------------------------------------------------
# Pallas kernel: one grid step == one tile of TM rows of the (B*N, d) slab.
# The codebook side (K^T, V) is precomputed in the wrapper and stays resident.
# ----------------------------------------------------------------------------
def _attn_codebook_kernel(
    scalars_ref,            # SMEM (3,) f32: tau, residual_scaling, gumbel_noise_scale
    lat_ref,                # (TM, d)  f32   latent rows (batch folded into M)
    cosq_ref, sinq_ref,     # (TM, d)  f32   query RoPE tables (sin sign-folded)
    gumbel_ref,             # (TM, Cp) f32   gumbel noise (zero in padded cols)
    bias_ref,               # (1, Cp)  f32   0 for real codes, -1e30 for padding
    kT_ref,                 # (d, Cp)  bf16  RoPE'd keys, pre-transposed
    v_ref,                  # (Cp, d)  bf16  values (bias already folded in)
    s_q_ref, s_ff_ref,      # (1, d)   f32   RMSNorm scales
    wq_ref,                 # (d, d)   bf16
    wc_ref,                 # (d, d)   bf16
    w13_ref,                # (d, 2H)  bf16  fused [w1 | w3]
    w2_ref,                 # (H, d)   bf16
    out_ref,                # (TM, d)  f32   codebook_output rows
    la_ref,                 # (TM, Cp) f32   log_alpha
    z_ref,                  # (TM, Cp) f32   softmax assignments
):
    f32 = jnp.float32
    bf16 = jnp.bfloat16
    eps = 1e-6

    tau = scalars_ref[0]
    res_scale = scalars_ref[1]
    g_scale = scalars_ref[2]
    inv_tau = 1.0 / tau

    d = lat_ref.shape[-1]
    half = d // 2
    H = w2_ref.shape[0]

    def rmsnorm(x, scale_row):
        ms = jnp.mean(x * x, axis=-1, keepdims=True)
        return (x * lax.rsqrt(ms + eps)) * scale_row

    def rope(x, cos, sin_signed):
        # rotate_half(x) == roll(x, d/2, lanes) * ([-1]*half ++ [+1]*half);
        # the sign is folded into sin_signed in the wrapper, so the roll runs
        # on the XLU slot and no iota/select or extra matmul is needed.
        return x * cos + pltpu.roll(x, shift=half, axis=1) * sin_signed

    # ---- queries (batch folded into the matmul M dimension) ----------------
    lat = lat_ref[...]                                                     # (TM, d) f32
    nq = rmsnorm(lat, s_q_ref[...])
    q = jnp.dot(nq.astype(bf16), wq_ref[...], preferred_element_type=f32)  # (TM, d)
    q = rope(q, cosq_ref[...], sinq_ref[...])

    # ---- attention over the codebook ----------------------------------------
    log_alpha = jnp.dot(q.astype(bf16), kT_ref[...],
                        preferred_element_type=f32) * f32(1.0 / math.sqrt(d))  # (TM, Cp)
    logits = (log_alpha + g_scale * gumbel_ref[...]) * inv_tau + bias_ref[...]

    m = jnp.max(logits, axis=-1, keepdims=True)
    e = jnp.exp(logits - m)
    z = e * pl.reciprocal(jnp.sum(e, axis=-1, keepdims=True), approx=True)     # (TM, Cp)

    attn = jnp.dot(z.astype(bf16), v_ref[...], preferred_element_type=f32)     # (TM, d)
    y = jnp.dot(attn.astype(bf16), wc_ref[...], preferred_element_type=f32)    # c_proj
    attn_out = res_scale * lat + y

    # ---- SwiGLU FFN: w2( silu(w1(x)) * w3(x) ), w1/w3 fused into one matmul;
    # ---- H is lane aligned so the two slices stay inside (8,128) tiles. -----
    nf = rmsnorm(attn_out, s_ff_ref[...])
    h13 = jnp.dot(nf.astype(bf16), w13_ref[...], preferred_element_type=f32)   # (TM, 2H)
    h1 = h13[:, :H]
    h3 = h13[:, H:]
    sig = 1.0 / (1.0 + jnp.exp(-h1))
    ff = jnp.dot(((h1 * sig) * h3).astype(bf16), w2_ref[...],
                 preferred_element_type=f32)

    out_ref[...] = attn_out + ff
    la_ref[...] = log_alpha
    z_ref[...] = z


# ----------------------------------------------------------------------------
# Glue: RoPE tables, sign folding, K/V hoisting, padding, pallas_call wiring.
# ----------------------------------------------------------------------------
def rope_cos_sin(positions, d):
    """Standard half-split RoPE tables: (B, T) int positions -> (B, T, d)."""
    inv_freq = 1.0 / (10000.0 ** (jnp.arange(0, d, 2, dtype=jnp.float32) / d))  # (d/2,)
    ang = positions[..., None].astype(jnp.float32) * inv_freq                   # (B, T, d/2)
    cos = jnp.concatenate([jnp.cos(ang), jnp.cos(ang)], axis=-1)                # (B, T, d)
    sin = jnp.concatenate([jnp.sin(ang), jnp.sin(ang)], axis=-1)
    return cos, sin


def _rotate_half(x):
    h = x.shape[-1] // 2
    return jnp.concatenate([-x[..., h:], x[..., :h]], axis=-1)


def _vmem_capacity_bytes():
    try:
        info = pltpu.get_tpu_info()
        return int(getattr(info, "vmem_capacity_bytes", 64 * 1024 * 1024))
    except Exception:                      # conservative fallback (v7x-sized)
        return 64 * 1024 * 1024


def _pick_block_m(M, target):
    """Largest multiple-of-8 divisor of M that is <= target (else M itself)."""
    if M <= target:
        return M
    t = target - (target % 8)
    while t >= 8:
        if M % t == 0:
            return t
        t -= 8
    return M


def attn_codebook_forward(params, latents, tau, residual_scaling, positions,
                          gumbel, gumbel_noise_scale, block_m=None):
    f32, bf16 = jnp.float32, jnp.bfloat16
    eps = 1e-6

    B, N, d = latents.shape
    C = params["codebook"].shape[0]
    H = params["w1"].shape[0]
    half = d // 2
    M = B * N

    # Lane alignment: keeps matmul operands/results and the h13 slice on
    # (8,128) tile boundaries (ideally d % 256 == 0 on the v6e/v7x MXUs).
    assert d % 128 == 0, "d_model must be a multiple of 128"
    assert H % 128 == 0, "FFN hidden dim must be a multiple of 128"
    Cp = ((C + 127) // 128) * 128          # lane-dense codebook axis (padded)

    # Per-generation VMEM budget: 64 MiB physical on v7x, 128 MiB on v5e/v6e.
    vmem_cap = _vmem_capacity_bytes()
    vmem_limit = min((vmem_cap * 3) // 4, 100 * 1024 * 1024)
    if block_m is None:
        block_m = _pick_block_m(M, target=1024 if vmem_cap >= (96 << 20) else 512)
    assert M % block_m == 0, "block_m must divide B*N"
    grid = (M // block_m,)

    # ---- RoPE tables (query side streamed per row; sin sign-folded so the
    # ---- kernel rotate-half is a single XLU roll) ---------------------------
    cos, sin = rope_cos_sin(positions, d)                     # (B, T, d)
    sign = jnp.concatenate([-jnp.ones((half,), f32), jnp.ones((half,), f32)])
    cos_q = cos[:, :N].reshape(M, d)
    sin_q = (sin[:, :N] * sign).reshape(M, d)

    # ---- batch-invariant codebook side, hoisted out of the kernel ----------
    # Key positions are assumed identical across the batch (module usage).
    # TODO(synk): genuinely per-batch key positions would require per-batch K.
    codebook = params["codebook"]
    ms = jnp.mean(codebook * codebook, axis=-1, keepdims=True)
    nc = codebook * lax.rsqrt(ms + eps) * params["s_ctx"]
    k = jnp.dot(nc, params["wk"].T, preferred_element_type=f32)            # (C, d)
    v = jnp.dot(nc, params["wv"].T, preferred_element_type=f32) + params["bv"]
    k = k * cos[0, :C] + _rotate_half(k) * sin[0, :C]                      # RoPE on K

    pad_c = Cp - C
    kT = jnp.pad(k.T, ((0, 0), (0, pad_c))).astype(bf16)                   # (d, Cp)
    v_p = jnp.pad(v, ((0, pad_c), (0, 0))).astype(bf16)                    # (Cp, d)
    gum2 = jnp.pad(gumbel.reshape(M, C), ((0, 0), (0, pad_c)))             # (M, Cp)
    col_bias = jnp.where(jnp.arange(Cp) < C, 0.0, -1e30).astype(f32)[None, :]

    lat2 = latents.reshape(M, d)
    scalars = jnp.stack([jnp.asarray(tau, f32),
                         jnp.asarray(residual_scaling, f32),
                         jnp.asarray(gumbel_noise_scale, f32)])            # (3,)

    # PyTorch Linear weights are (out, in): transpose to (in, out), cast bf16.
    wq_t = params["wq"].T.astype(bf16)
    wc_t = params["wc"].T.astype(bf16)
    w13_t = jnp.concatenate([params["w1"].T, params["w3"].T], axis=1).astype(bf16)
    w2_t = params["w2"].T.astype(bf16)

    tm = block_m
    const = lambda i: (0, 0)
    row = lambda i: (i, 0)

    in_specs = [
        pl.BlockSpec(memory_space=pltpu.MemorySpace.SMEM),    # scalars
        pl.BlockSpec((tm, d), row),                           # latent rows
        pl.BlockSpec((tm, d), row),                           # cos_q
        pl.BlockSpec((tm, d), row),                           # sin_q (signed)
        pl.BlockSpec((tm, Cp), row),                          # gumbel (padded)
        pl.BlockSpec((1, Cp), const),                         # pad mask bias
        pl.BlockSpec((d, Cp), const),                         # K^T  (bf16, resident)
        pl.BlockSpec((Cp, d), const),                         # V    (bf16, resident)
        pl.BlockSpec((1, d), const),                          # s_q
        pl.BlockSpec((1, d), const),                          # s_ff
        pl.BlockSpec((d, d), const),                          # wq_t
        pl.BlockSpec((d, d), const),                          # wc_t
        pl.BlockSpec((d, 2 * H), const),                      # w13_t (fused w1|w3)
        pl.BlockSpec((H, d), const),                          # w2_t
    ]
    out_specs = [
        pl.BlockSpec((tm, d), row),                           # codebook_output rows
        pl.BlockSpec((tm, Cp), row),                          # log_alpha
        pl.BlockSpec((tm, Cp), row),                          # z
    ]
    out_shape = (
        jax.ShapeDtypeStruct((M, d), f32),
        jax.ShapeDtypeStruct((M, Cp), f32),
        jax.ShapeDtypeStruct((M, Cp), f32),
    )

    out2, la2, z2 = pl.pallas_call(
        _attn_codebook_kernel,
        out_shape=out_shape,
        grid_spec=pltpu.PrefetchScalarGridSpec(
            num_scalar_prefetch=0,
            grid=grid,
            in_specs=in_specs,
            out_specs=out_specs,
        ),
        compiler_params=pltpu.CompilerParams(
            # K/V are inputs (no cross-step state), so the row-tile axis is
            # truly parallel: v7x megacore shards it, no-op on v5e/v6e.
            dimension_semantics=("parallel",),
            vmem_limit_bytes=vmem_limit,
        ),
    )(scalars, lat2, cos_q, sin_q, gum2, col_bias, kT, v_p,
      params["s_q"], params["s_ff"], wq_t, wc_t, w13_t, w2_t)

    out = out2.reshape(B, N, d)
    log_alpha = la2[:, :C].reshape(B, N, C)
    z = z2[:, :C].reshape(B, N, C)
    # Recomputed here instead of being a third (M, Cp) f32 kernel output:
    # pure HBM-write savings, values identical up to f32 rounding.
    log_alpha_tau = (log_alpha + jnp.asarray(gumbel_noise_scale, f32) * gumbel) \
        / jnp.asarray(tau, f32)
    return out, log_alpha, log_alpha_tau, z


# ----------------------------------------------------------------------------
# Pure-JAX reference (mirrors the PyTorch math) for verification.
#   mm_dtype=float32  -> original module's f32 math.
#   mm_dtype=bfloat16 -> mirrors the kernel's bf16 MXU operands (f32 acc).
# ----------------------------------------------------------------------------
def reference_forward(params, latents, tau, residual_scaling, positions,
                      gumbel, gumbel_noise_scale, mm_dtype=jnp.float32):
    f32 = jnp.float32
    eps = 1e-6
    B, N, d = latents.shape
    C = params["codebook"].shape[0]

    def mm(a, b):
        return jnp.dot(a.astype(mm_dtype), b.astype(mm_dtype),
                       preferred_element_type=f32)

    def rmsnorm(x, scale):
        ms = jnp.mean(x * x, axis=-1, keepdims=True)
        return x * lax.rsqrt(ms + eps) * scale

    nc = rmsnorm(params["codebook"], params["s_ctx"])
    nq = rmsnorm(latents, params["s_q"])

    # K/V are produced in f32 (as in the kernel wrapper) and only cast at the
    # attention matmuls.
    k = jnp.dot(nc, params["wk"].T, preferred_element_type=f32)
    v = jnp.dot(nc, params["wv"].T, preferred_element_type=f32) + params["bv"]

    cos, sin = rope_cos_sin(positions, d)
    q = mm(nq, params["wq"].T)
    q = q * cos[:, :N] + _rotate_half(q) * sin[:, :N]
    k = k * cos[0, :C] + _rotate_half(k) * sin[0, :C]     # shared key positions

    log_alpha = mm(q, k.T) / jnp.sqrt(f32(d))
    log_alpha_tau = (log_alpha + gumbel_noise_scale * gumbel) / tau
    z = jax.nn.softmax(log_alpha_tau, axis=-1)
    attn = mm(z, v)
    y = mm(attn, params["wc"].T)

    attn_out = residual_scaling * latents + y
    nf = rmsnorm(attn_out, params["s_ff"])
    h1 = mm(nf, params["w1"].T)
    h3 = mm(nf, params["w3"].T)
    ff = mm(jax.nn.silu(h1) * h3, params["w2"].T)
    return attn_out + ff, log_alpha, log_alpha_tau, z


# ----------------------------------------------------------------------------
if __name__ == "__main__":
    # Small but lane-friendly shapes: d_model = 128 (one lane tile), H = 4*d.
    # C = 64 deliberately exercises the pad-to-128 / masked-softmax path.
    B, N, d_model, C = 2, 16, 128, 64
    H = 4 * d_model

    key = jax.random.PRNGKey(0)
    ks = jax.random.split(key, 12)

    params = {
        "codebook": 0.02 * jax.random.normal(ks[0], (C, d_model), jnp.float32),
        "s_ctx": jnp.ones((1, d_model), jnp.float32),
        "s_q": jnp.ones((1, d_model), jnp.float32),
        "s_ff": jnp.ones((1, d_model), jnp.float32),
        "wq": (1.0 / math.sqrt(d_model)) * jax.random.normal(ks[1], (d_model, d_model), jnp.float32),
        "wk": (1.0 / math.sqrt(d_model)) * jax.random.normal(ks[2], (d_model, d_model), jnp.float32),
        "wv": (1.0 / math.sqrt(d_model)) * jax.random.normal(ks[3], (d_model, d_model), jnp.float32),
        "bv": 0.02 * jax.random.normal(ks[4], (1, d_model), jnp.float32),
        "wc": (1.0 / math.sqrt(d_model)) * jax.random.normal(ks[5], (d_model, d_model), jnp.float32),
        "w1": (1.0 / math.sqrt(d_model)) * jax.random.normal(ks[6], (H, d_model), jnp.float32),
        "w2": (1.0 / math.sqrt(H)) * jax.random.normal(ks[7], (d_model, H), jnp.float32),
        "w3": (1.0 / math.sqrt(d_model)) * jax.random.normal(ks[8], (H, d_model), jnp.float32),
    }

    latents = jax.random.normal(ks[9], (B, N, d_model), jnp.float32)
    T = max(N, C)
    positions = jnp.broadcast_to(jnp.arange(T, dtype=jnp.int32)[None, :], (B, T))

    tau = jnp.float32(0.7)
    residual_scaling = jnp.float32(1.0)
    gumbel_noise_scale = jnp.float32(0.3)
    u = jax.random.uniform(ks[10], (B, N, C), jnp.float32)
    gumbel = -jnp.log(-jnp.log(u + 1e-10) + 1e-10)

    # block_m=16 -> 2 grid steps: exercises the row-tiled ("parallel") grid.
    outs = attn_codebook_forward(params, latents, tau, residual_scaling,
                                 positions, gumbel, gumbel_noise_scale,
                                 block_m=16)
    outs = jax.block_until_ready(outs)

    # Tight check vs a reference that mirrors the kernel's bf16 MXU operands.
    refs_bf16 = reference_forward(params, latents, tau, residual_scaling,
                                  positions, gumbel, gumbel_noise_scale,
                                  mm_dtype=jnp.bfloat16)
    for o, r in zip(outs, refs_bf16):
        np.testing.assert_allclose(np.asarray(o), np.asarray(r), atol=3e-2, rtol=3e-2)

    # Loose sanity check vs the pure-f32 module math (difference == bf16 MXU).
    refs_f32 = reference_forward(params, latents, tau, residual_scaling,
                                 positions, gumbel, gumbel_noise_scale,
                                 mm_dtype=jnp.float32)
    for o, r in zip(outs, refs_f32):
        np.testing.assert_allclose(np.asarray(o), np.asarray(r), atol=3e-1, rtol=3e-1)

    print("KERNEL_OK")
</pallas_src>

<mosaic_0001>
module attributes {stable_mosaic.version = 11 : i64} {
  func.func @_attn_codebook_kernel(%arg0: i32, %arg1: memref<3xf32, #tpu.memory_space<smem>>, %arg2: memref<16x128xf32, #tpu.memory_space<vmem>>, %arg3: memref<16x128xf32, #tpu.memory_space<vmem>>, %arg4: memref<16x128xf32, #tpu.memory_space<vmem>>, %arg5: memref<16x128xf32, #tpu.memory_space<vmem>>, %arg6: memref<1x128xf32, #tpu.memory_space<vmem>>, %arg7: memref<128x128xbf16, #tpu.memory_space<vmem>>, %arg8: memref<128x128xbf16, #tpu.memory_space<vmem>>, %arg9: memref<1x128xf32, #tpu.memory_space<vmem>>, %arg10: memref<1x128xf32, #tpu.memory_space<vmem>>, %arg11: memref<128x128xbf16, #tpu.memory_space<vmem>>, %arg12: memref<128x128xbf16, #tpu.memory_space<vmem>>, %arg13: memref<128x1024xbf16, #tpu.memory_space<vmem>>, %arg14: memref<512x128xbf16, #tpu.memory_space<vmem>>, %arg15: memref<16x128xf32, #tpu.memory_space<vmem>>, %arg16: memref<16x128xf32, #tpu.memory_space<vmem>>, %arg17: memref<16x128xf32, #tpu.memory_space<vmem>>) attributes {dimension_semantics = [#tpu.dimension_semantics<parallel>], iteration_bounds = array<i64: 2>, scalar_prefetch = 0 : i64, scratch_operands = 0 : i64, tpu.core_type = #tpu.core_type<tc>, window_params = [{transform_indices = @transform_0, window_bounds = array<i64: 3>}, {transform_indices = @transform_1, window_bounds = array<i64: 16, 128>}, {transform_indices = @transform_2, window_bounds = array<i64: 16, 128>}, {transform_indices = @transform_3, window_bounds = array<i64: 16, 128>}, {transform_indices = @transform_4, window_bounds = array<i64: 16, 128>}, {pipeline_mode = #tpu.pipeline_mode<synchronous>, transform_indices = @transform_5, window_bounds = array<i64: 1, 128>}, {pipeline_mode = #tpu.pipeline_mode<synchronous>, transform_indices = @transform_6, window_bounds = array<i64: 128, 128>}, {pipeline_mode = #tpu.pipeline_mode<synchronous>, transform_indices = @transform_7, window_bounds = array<i64: 128, 128>}, {pipeline_mode = #tpu.pipeline_mode<synchronous>, transform_indices = @transform_8, window_bounds = array<i64: 1, 128>}, {pipeline_mode = #tpu.pipeline_mode<synchronous>, transform_indices = @transform_9, window_bounds = array<i64: 1, 128>}, {pipeline_mode = #tpu.pipeline_mode<synchronous>, transform_indices = @transform_10, window_bounds = array<i64: 128, 128>}, {pipeline_mode = #tpu.pipeline_mode<synchronous>, transform_indices = @transform_11, window_bounds = array<i64: 128, 128>}, {pipeline_mode = #tpu.pipeline_mode<synchronous>, transform_indices = @transform_12, window_bounds = array<i64: 128, 1024>}, {pipeline_mode = #tpu.pipeline_mode<synchronous>, transform_indices = @transform_13, window_bounds = array<i64: 512, 128>}, {transform_indices = @transform_14, window_bounds = array<i64: 16, 128>}, {transform_indices = @transform_15, window_bounds = array<i64: 16, 128>}, {transform_indices = @transform_16, window_bounds = array<i64: 16, 128>}]} {
    %c0 = arith.constant 0 : index
    %0 = memref.load %arg1[%c0] : memref<3xf32, #tpu.memory_space<smem>>
    %c1 = arith.constant 1 : index
    %1 = memref.load %arg1[%c1] : memref<3xf32, #tpu.memory_space<smem>>
    %c2 = arith.constant 2 : index
    %2 = memref.load %arg1[%c2] : memref<3xf32, #tpu.memory_space<smem>>
    %cst = arith.constant 1.000000e+00 : f32
    %3 = arith.divf %cst, %0 : f32
    %c0_0 = arith.constant 0 : index
    %c0_1 = arith.constant 0 : index
    %4 = vector.load %arg2[%c0_0, %c0_1] : memref<16x128xf32, #tpu.memory_space<vmem>>, vector<16x128xf32>
    %c0_2 = arith.constant 0 : index
    %c0_3 = arith.constant 0 : index
    %5 = vector.load %arg9[%c0_2, %c0_3] : memref<1x128xf32, #tpu.memory_space<vmem>>, vector<1x128xf32>
    %6 = arith.mulf %4, %4 : vector<16x128xf32>
    %cst_4 = arith.constant dense<0.000000e+00> : vector<16xf32>
    %7 = vector.multi_reduction <add>, %6, %cst_4 [1] : vector<16x128xf32> to vector<16xf32>
    %8 = vector.shape_cast %7 : vector<16xf32> to vector<16x1xf32>
    %cst_5 = arith.constant 1.280000e+02 : f32
    %9 = vector.broadcast %cst_5 : f32 to vector<16x1xf32>
    %10 = arith.divf %8, %9 : vector<16x1xf32>
    %cst_6 = arith.constant 9.99999997E-7 : f32
    %11 = vector.broadcast %cst_6 : f32 to vector<16x1xf32>
    %12 = arith.addf %10, %11 : vector<16x1xf32>
    %13 = math.rsqrt %12 : vector<16x1xf32>
    %14 = vector.broadcast %13 : vector<16x1xf32> to vector<16x128xf32>
    %15 = arith.mulf %4, %14 : vector<16x128xf32>
    %16 = vector.broadcast %5 : vector<1x128xf32> to vector<16x128xf32>
    %17 = arith.mulf %15, %16 : vector<16x128xf32>
    %18 = arith.truncf %17 : vector<16x128xf32> to vector<16x128xbf16>
    %c0_7 = arith.constant 0 : index
    %c0_8 = arith.constant 0 : index
    %19 = vector.load %arg11[%c0_7, %c0_8] : memref<128x128xbf16, #tpu.memory_space<vmem>>, vector<128x128xbf16>
    %cst_9 = arith.constant dense<0.000000e+00> : vector<16x128xf32>
    %20 = tpu.matmul %18, %19, %cst_9 {dimension_numbers = #tpu.dot_dimension_numbers<[1], [0], [0], [1], [0, 0, 1, 1], [], []>} : vector<16x128xbf16>, vector<128x128xbf16>, vector<16x128xf32> -> vector<16x128xf32>
    %c0_10 = arith.constant 0 : index
    %c0_11 = arith.constant 0 : index
    %21 = vector.load %arg3[%c0_10, %c0_11] : memref<16x128xf32, #tpu.memory_space<vmem>>, vector<16x128xf32>
    %c0_12 = arith.constant 0 : index
    %c0_13 = arith.constant 0 : index
    %22 = vector.load %arg4[%c0_12, %c0_13] : memref<16x128xf32, #tpu.memory_space<vmem>>, vector<16x128xf32>
    %23 = arith.mulf %20, %21 : vector<16x128xf32>
    %c64_i32 = arith.constant 64 : i32
    %24 = tpu.dynamic_rotate %20 by %c64_i32 dim 1 : vector<16x128xf32>, i32 -> vector<16x128xf32>
    %25 = arith.mulf %24, %22 : vector<16x128xf32>
    %26 = arith.addf %23, %25 : vector<16x128xf32>
    %27 = arith.truncf %26 : vector<16x128xf32> to vector<16x128xbf16>
    %c0_14 = arith.constant 0 : index
    %c0_15 = arith.constant 0 : index
    %28 = vector.load %arg7[%c0_14, %c0_15] : memref<128x128xbf16, #tpu.memory_space<vmem>>, vector<128x128xbf16>
    %cst_16 = arith.constant dense<0.000000e+00> : vector<16x128xf32>
    %29 = tpu.matmul %27, %28, %cst_16 {dimension_numbers = #tpu.dot_dimension_numbers<[1], [0], [0], [1], [0, 0, 1, 1], [], []>} : vector<16x128xbf16>, vector<128x128xbf16>, vector<16x128xf32> -> vector<16x128xf32>
    %cst_17 = arith.constant 0.0883883461 : f32
    %30 = vector.broadcast %cst_17 : f32 to vector<16x128xf32>
    %31 = arith.mulf %29, %30 : vector<16x128xf32>
    %c0_18 = arith.constant 0 : index
    %c0_19 = arith.constant 0 : index
    %32 = vector.load %arg5[%c0_18, %c0_19] : memref<16x128xf32, #tpu.memory_space<vmem>>, vector<16x128xf32>
    %33 = vector.broadcast %2 : f32 to vector<16x128xf32>
    %34 = arith.mulf %33, %32 : vector<16x128xf32>
    %35 = arith.addf %31, %34 : vector<16x128xf32>
    %36 = vector.broadcast %3 : f32 to vector<16x128xf32>
    %37 = arith.mulf %35, %36 : vector<16x128xf32>
    %c0_20 = arith.constant 0 : index
    %c0_21 = arith.constant 0 : index
    %38 = vector.load %arg6[%c0_20, %c0_21] : memref<1x128xf32, #tpu.memory_space<vmem>>, vector<1x128xf32>
    %39 = vector.broadcast %38 : vector<1x128xf32> to vector<16x128xf32>
    %40 = arith.addf %37, %39 : vector<16x128xf32>
    %cst_22 = arith.constant dense<0xFF800000> : vector<16xf32>
    %41 = vector.multi_reduction <maximumf>, %40, %cst_22 [1] : vector<16x128xf32> to vector<16xf32>
    %42 = vector.shape_cast %41 : vector<16xf32> to vector<16x1xf32>
    %43 = vector.broadcast %42 : vector<16x1xf32> to vector<16x128xf32>
    %44 = arith.subf %40, %43 : vector<16x128xf32>
    %45 = math.exp %44 : vector<16x128xf32>
    %cst_23 = arith.constant dense<0.000000e+00> : vector<16xf32>
    %46 = vector.multi_reduction <add>, %45, %cst_23 [1] : vector<16x128xf32> to vector<16xf32>
    %47 = vector.shape_cast %46 : vector<16xf32> to vector<16x1xf32>
    %48 = tpu.reciprocal %47 {approx = true} : vector<16x1xf32> -> vector<16x1xf32>
    %49 = vector.broadcast %48 : vector<16x1xf32> to vector<16x128xf32>
    %50 = arith.mulf %45, %49 : vector<16x128xf32>
    %51 = arith.truncf %50 : vector<16x128xf32> to vector<16x128xbf16>
    %c0_24 = arith.constant 0 : index
    %c0_25 = arith.constant 0 : index
    %52 = vector.load %arg8[%c0_24, %c0_25] : memref<128x128xbf16, #tpu.memory_space<vmem>>, vector<128x128xbf16>
    %cst_26 = arith.constant dense<0.000000e+00> : vector<16x128xf32>
    %53 = tpu.matmul %51, %52, %cst_26 {dimension_numbers = #tpu.dot_dimension_numbers<[1], [0], [0], [1], [0, 0, 1, 1], [], []>} : vector<16x128xbf16>, vector<128x128xbf16>, vector<16x128xf32> -> vector<16x128xf32>
    %54 = arith.truncf %53 : vector<16x128xf32> to vector<16x128xbf16>
    %c0_27 = arith.constant 0 : index
    %c0_28 = arith.constant 0 : index
    %55 = vector.load %arg12[%c0_27, %c0_28] : memref<128x128xbf16, #tpu.memory_space<vmem>>, vector<128x128xbf16>
    %cst_29 = arith.constant dense<0.000000e+00> : vector<16x128xf32>
    %56 = tpu.matmul %54, %55, %cst_29 {dimension_numbers = #tpu.dot_dimension_numbers<[1], [0], [0], [1], [0, 0, 1, 1], [], []>} : vector<16x128xbf16>, vector<128x128xbf16>, vector<16x128xf32> -> vector<16x128xf32>
    %57 = vector.broadcast %1 : f32 to vector<16x128xf32>
    %58 = arith.mulf %57, %4 : vector<16x128xf32>
    %59 = arith.addf %58, %56 : vector<16x128xf32>
    %c0_30 = arith.constant 0 : index
    %c0_31 = arith.constant 0 : index
    %60 = vector.load %arg10[%c0_30, %c0_31] : memref<1x128xf32, #tpu.memory_space<vmem>>, vector<1x128xf32>
    %61 = arith.mulf %59, %59 : vector<16x128xf32>
    %cst_32 = arith.constant dense<0.000000e+00> : vector<16xf32>
    %62 = vector.multi_reduction <add>, %61, %cst_32 [1] : vector<16x128xf32> to vector<16xf32>
    %63 = vector.shape_cast %62 : vector<16xf32> to vector<16x1xf32>
    %cst_33 = arith.constant 1.280000e+02 : f32
    %64 = vector.broadcast %cst_33 : f32 to vector<16x1xf32>
    %65 = arith.divf %63, %64 : vector<16x1xf32>
    %cst_34 = arith.constant 9.99999997E-7 : f32
    %66 = vector.broadcast %cst_34 : f32 to vector<16x1xf32>
    %67 = arith.addf %65, %66 : vector<16x1xf32>
    %68 = math.rsqrt %67 : vector<16x1xf32>
    %69 = vector.broadcast %68 : vector<16x1xf32> to vector<16x128xf32>
    %70 = arith.mulf %59, %69 : vector<16x128xf32>
    %71 = vector.broadcast %60 : vector<1x128xf32> to vector<16x128xf32>
    %72 = arith.mulf %70, %71 : vector<16x128xf32>
    %73 = arith.truncf %72 : vector<16x128xf32> to vector<16x128xbf16>
    %c0_35 = arith.constant 0 : index
    %c0_36 = arith.constant 0 : index
    %74 = vector.load %arg13[%c0_35, %c0_36] : memref<128x1024xbf16, #tpu.memory_space<vmem>>, vector<128x1024xbf16>
    %cst_37 = arith.constant dense<0.000000e+00> : vector<16x1024xf32>
    %75 = tpu.matmul %73, %74, %cst_37 {dimension_numbers = #tpu.dot_dimension_numbers<[1], [0], [0], [1], [0, 0, 1, 1], [], []>} : vector<16x128xbf16>, vector<128x1024xbf16>, vector<16x1024xf32> -> vector<16x1024xf32>
    %76 = vector.extract_strided_slice %75 {offsets = [0, 0], sizes = [16, 512], strides = [1, 1]} : vector<16x1024xf32> to vector<16x512xf32>
    %77 = vector.extract_strided_slice %75 {offsets = [0, 512], sizes = [16, 512], strides = [1, 1]} : vector<16x1024xf32> to vector<16x512xf32>
    %cst_38 = arith.constant 0.000000e+00 : f32
    %78 = vector.broadcast %cst_38 : f32 to vector<16x512xf32>
    %79 = arith.subf %78, %76 : vector<16x512xf32>
    %80 = math.exp %79 : vector<16x512xf32>
    %cst_39 = arith.constant 1.000000e+00 : f32
    %81 = vector.broadcast %cst_39 : f32 to vector<16x512xf32>
    %82 = arith.addf %81, %80 : vector<16x512xf32>
    %cst_40 = arith.constant 1.000000e+00 : f32
    %83 = vector.broadcast %cst_40 : f32 to vector<16x512xf32>
    %84 = arith.divf %83, %82 : vector<16x512xf32>
    %85 = arith.mulf %76, %84 : vector<16x512xf32>
    %86 = arith.mulf %85, %77 : vector<16x512xf32>
    %87 = arith.truncf %86 : vector<16x512xf32> to vector<16x512xbf16>
    %c0_41 = arith.constant 0 : index
    %c0_42 = arith.constant 0 : index
    %88 = vector.load %arg14[%c0_41, %c0_42] : memref<512x128xbf16, #tpu.memory_space<vmem>>, vector<512x128xbf16>
    %cst_43 = arith.constant dense<0.000000e+00> : vector<16x128xf32>
    %89 = tpu.matmul %87, %88, %cst_43 {dimension_numbers = #tpu.dot_dimension_numbers<[1], [0], [0], [1], [0, 0, 1, 1], [], []>} : vector<16x512xbf16>, vector<512x128xbf16>, vector<16x128xf32> -> vector<16x128xf32>
    %90 = arith.addf %59, %89 : vector<16x128xf32>
    %c0_44 = arith.constant 0 : index
    %c0_45 = arith.constant 0 : index
    %91 = vector.load %arg15[%c0_44, %c0_45] : memref<16x128xf32, #tpu.memory_space<vmem>>, vector<16x128xf32>
    tpu.vector_store %arg15[%c0_44, %c0_45], %90 {strides = array<i32>} : memref<16x128xf32, #tpu.memory_space<vmem>>, vector<16x128xf32>,
    %c0_46 = arith.constant 0 : index
    %c0_47 = arith.constant 0 : index
    %92 = vector.load %arg16[%c0_46, %c0_47] : memref<16x128xf32, #tpu.memory_space<vmem>>, vector<16x128xf32>
    tpu.vector_store %arg16[%c0_46, %c0_47], %31 {strides = array<i32>} : memref<16x128xf32, #tpu.memory_space<vmem>>, vector<16x128xf32>,
    %c0_48 = arith.constant 0 : index
    %c0_49 = arith.constant 0 : index
    %93 = vector.load %arg17[%c0_48, %c0_49] : memref<16x128xf32, #tpu.memory_space<vmem>>, vector<16x128xf32>
    tpu.vector_store %arg17[%c0_48, %c0_49], %50 {strides = array<i32>} : memref<16x128xf32, #tpu.memory_space<vmem>>, vector<16x128xf32>,
    return
  }
  func.func @transform_0(%arg0: i32) -> i32 {
    %c0_i32 = arith.constant 0 : i32
    %c0_i32_0 = arith.constant 0 : i32
    return %c0_i32 : i32
  }
  func.func @transform_1(%arg0: i32) -> (i32, i32) {
    %c0_i32 = arith.constant 0 : i32
    %c0_i32_0 = arith.constant 0 : i32
    return %arg0, %c0_i32 : i32, i32
  }
  func.func @transform_2(%arg0: i32) -> (i32, i32) {
    %c0_i32 = arith.constant 0 : i32
    %c0_i32_0 = arith.constant 0 : i32
    return %arg0, %c0_i32 : i32, i32
  }
  func.func @transform_3(%arg0: i32) -> (i32, i32) {
    %c0_i32 = arith.constant 0 : i32
    %c0_i32_0 = arith.constant 0 : i32
    return %arg0, %c0_i32 : i32, i32
  }
  func.func @transform_4(%arg0: i32) -> (i32, i32) {
    %c0_i32 = arith.constant 0 : i32
    %c0_i32_0 = arith.constant 0 : i32
    return %arg0, %c0_i32 : i32, i32
  }
  func.func @transform_5(%arg0: i32) -> (i32, i32) {
    %c0_i32 = arith.constant 0 : i32
    %c0_i32_0 = arith.constant 0 : i32
    %c0_i32_1 = arith.constant 0 : i32
    return %c0_i32, %c0_i32_0 : i32, i32
  }
  func.func @transform_6(%arg0: i32) -> (i32, i32) {
    %c0_i32 = arith.constant 0 : i32
    %c0_i32_0 = arith.constant 0 : i32
    %c0_i32_1 = arith.constant 0 : i32
    return %c0_i32, %c0_i32_0 : i32, i32
  }
  func.func @transform_7(%arg0: i32) -> (i32, i32) {
    %c0_i32 = arith.constant 0 : i32
    %c0_i32_0 = arith.constant 0 : i32
    %c0_i32_1 = arith.constant 0 : i32
    return %c0_i32, %c0_i32_0 : i32, i32
  }
  func.func @transform_8(%arg0: i32) -> (i32, i32) {
    %c0_i32 = arith.constant 0 : i32
    %c0_i32_0 = arith.constant 0 : i32
    %c0_i32_1 = arith.constant 0 : i32
    return %c0_i32, %c0_i32_0 : i32, i32
  }
  func.func @transform_9(%arg0: i32) -> (i32, i32) {
    %c0_i32 = arith.constant 0 : i32
    %c0_i32_0 = arith.constant 0 : i32
    %c0_i32_1 = arith.constant 0 : i32
    return %c0_i32, %c0_i32_0 : i32, i32
  }
  func.func @transform_10(%arg0: i32) -> (i32, i32) {
    %c0_i32 = arith.constant 0 : i32
    %c0_i32_0 = arith.constant 0 : i32
    %c0_i32_1 = arith.constant 0 : i32
    return %c0_i32, %c0_i32_0 : i32, i32
  }
  func.func @transform_11(%arg0: i32) -> (i32, i32) {
    %c0_i32 = arith.constant 0 : i32
    %c0_i32_0 = arith.constant 0 : i32
    %c0_i32_1 = arith.constant 0 : i32
    return %c0_i32, %c0_i32_0 : i32, i32
  }
  func.func @transform_12(%arg0: i32) -> (i32, i32) {
    %c0_i32 = arith.constant 0 : i32
    %c0_i32_0 = arith.constant 0 : i32
    %c0_i32_1 = arith.constant 0 : i32
    return %c0_i32, %c0_i32_0 : i32, i32
  }
  func.func @transform_13(%arg0: i32) -> (i32, i32) {
    %c0_i32 = arith.constant 0 : i32
    %c0_i32_0 = arith.constant 0 : i32
    %c0_i32_1 = arith.constant 0 : i32
    return %c0_i32, %c0_i32_0 : i32, i32
  }
  func.func @transform_14(%arg0: i32) -> (i32, i32) {
    %c0_i32 = arith.constant 0 : i32
    %c0_i32_0 = arith.constant 0 : i32
    return %arg0, %c0_i32 : i32, i32
  }
  func.func @transform_15(%arg0: i32) -> (i32, i32) {
    %c0_i32 = arith.constant 0 : i32
    %c0_i32_0 = arith.constant 0 : i32
    return %arg0, %c0_i32 : i32, i32
  }
  func.func @transform_16(%arg0: i32) -> (i32, i32) {
    %c0_i32 = arith.constant 0 : i32
    %c0_i32_0 = arith.constant 0 : i32
    return %arg0, %c0_i32 : i32, i32
  }
}

</mosaic_0001>

<bundles_post_ra>
// kernel: tpu_custom_call.1
= control target key start
LH: loop header
LB: loop body
LE: loop exit
PB: predicated region body
PF: predicated region fallthrough
CT: control target
= control target key end

     0   :  { %s4368_s0 = inlined_call_operand.hbm [shape: f32[3], index: 0, kind: input, shape index: {}]   ;;  %s4369_s1 = inlined_call_operand.hbm [shape: f32[32,128], index: 1, kind: input, shape index: {}]   ;;  %s4370_s2 = inlined_call_operand.hbm [shape: f32[32,128], index: 2, kind: input, shape index: {}]   ;;  %s4371_s3 = inlined_call_operand.hbm [shape: f32[32,128], index: 3, kind: input, shape index: {}]   ;;  %s4372_s4 = inlined_call_operand.hbm [shape: f32[32,128], index: 4, kind: input, shape index: {}]   ;;  %s4373_s5 = inlined_call_operand.vmem [shape: f32[1,128], index: 5, kind: input, shape index: {}]   ;;  %s4374_s6 = inlined_call_operand.hbm [shape: bf16[128,128], index: 6, kind: input, shape index: {}]   ;;  %s4375_s7 = inlined_call_operand.hbm [shape: bf16[128,128], index: 7, kind: input, shape index: {}]   ;;  %s4376_s8 = inlined_call_operand.vmem [shape: f32[1,128], index: 8, kind: input, shape index: {}]   ;;  %s4377_s9 = inlined_call_operand.vmem [shape: f32[1,128], index: 9, kind: input, shape index: {}]   ;;  %s4378_s10 = inlined_call_operand.hbm [shape: bf16[128,128], index: 10, kind: input, shape index: {}]   ;;  %s4379_s11 = inlined_call_operand.hbm [shape: bf16[128,128], index: 11, kind: input, shape index: {}]   ;;  %s4380_s12 = inlined_call_operand.hbm [shape: bf16[128,1024], index: 12, kind: input, shape index: {}]   ;;  %s4381_s13 = inlined_call_operand.hbm [shape: bf16[512,128], index: 13, kind: input, shape index: {}]   ;;  %s4382_s14 = inlined_call_operand.hbm [shape: f32[32,128], index: 14, kind: output, shape index: {0}]   ;;  %s4383_s15 = inlined_call_operand.hbm [shape: f32[32,128], index: 15, kind: output, shape index: {1}]   ;;  %s4384_s16 = inlined_call_operand.hbm [shape: f32[32,128], index: 16, kind: output, shape index: {2}]  }
   0x1   :  { %4411 = sst [smem:[#allocation41_spill]] %s4368_s0 }
   0x2   :  { %4412 = sst [smem:[#allocation42_spill]] %s4370_s2 }
   0x3   :  { %4413 = sst [smem:[#allocation43_spill]] %s4373_s5 }
   0x4   :  { %4414 = sst [smem:[#allocation44_spill]] %s4374_s6 }
   0x5   :  { %4415 = sst [smem:[#allocation45_spill]] %s4375_s7 }
   0x6   :  { %4416 = sst [smem:[#allocation46_spill]] %s4376_s8 }
   0x7   :  { %4417 = sst [smem:[#allocation47_spill]] %s4377_s9 }
   0x8   :  { %4418 = sst [smem:[#allocation48_spill]] %s4379_s11 }
   0x9   :  { %4419 = sst [smem:[#allocation49_spill]] %s4382_s14 }
   0xa   :  { %4420 = sst [smem:[#allocation50_spill]] %s4383_s15 }
   0xb   :  { %4421 = sst [smem:[#allocation51_spill]] %s4384_s16 }
   0xc   :  { %22 = vsyncpa [#allocation5], 0 }
   0xd   :  { %23 = vsyncpa [#allocation3], 0 }
   0xe   :  { %25 = vsyncpa [#allocation3 + $0x1], 0 }
   0xf   :  { %26 = vsyncpa [#allocation8], 0 }
  0x10   :  { %28 = vsyncpa [#allocation8 + $0x1], 0 }
  0x11   :  { %29 = vsyncpa [#allocation11], 0 }
  0x12   :  { %31 = vsyncpa [#allocation11 + $0x1], 0 }
  0x13   :  { %32 = vsyncpa [#allocation14], 0 }
  0x14   :  { %33 = vsyncpa [#allocation17], 0 }
  0x15   :  { %34 = vsyncpa [#allocation20], 0 }
  0x16   :  { %35 = vsyncpa [#allocation4], 0 }
  0x17   :  { %37 = vsyncpa [#allocation4 + $0x1], 0 }
  0x18   :  { %38 = vsyncpa [#allocation23], 0 }
  0x19   :  { %40 = vsyncpa [#allocation23 + $0x1], 0  ;;  %s3773_s21 = smov 0   ;;  %s3775_s22 = smov 0  }
  0x1a   :  { %s3777_s23 = smov 0   ;;  %s3779_s24 = smov 0  }
  0x1b LB: > { %4422 = sst [smem:[#allocation35_spill]] %s3648_s21  ;;  %s3662_s25 = smov [#allocation12]   ;;  %s3660_s24 = sphi %s3779_s24, %s4473_s24   ;;  %s3656_s23 = sphi %s3777_s23, %s4477_s23   ;;  %s3652_s22 = sphi %s3775_s22, %s4476_s22   ;;  %s3648_s21 = sphi %s3773_s21, %s4475_s21  }
  0x1c   : > { %s467_s26 = sshll.u32 %s3662_s25, 4  ;;  %s3794_s27 = sadd.s32 4294967295, %s3660_s24   ;;  %s468_s26 = int_to_ptr.vmem [resolvable:$true] %s467_s26 }
  0x1d   : > { %p2616_p0 = scmp.ge.s32.totalorder %s3660_s24, 1  ;;  %p4401_p1 = scmp.eq.s32.totalorder %s3794_s27, 0 }
  0x1e   : > { %p443_p2 = scmp.lt.s32.totalorder %s3660_s24, 3  ;;  %s3663_s29 = smov [#allocation13]  }
  0x1f   : > { %s480_s30 = sshll.u32 %s3663_s29, 4  ;;  %s3664_s17 = smov [#allocation16]   ;;  %s3812_s30 = int_to_ptr.vmem [resolvable:$true] %s480_s30 }
  0x20   : > { %p3799_p3 = pnand %p2616_p0, %p443_p2  ;;  %s512_s18 = sshll.u32 %s3664_s17, 4  ;;  %s3814_s18 = int_to_ptr.vmem [resolvable:$true] %s512_s18 }
  0x21   : > { %s3244_s20 = scalar_lea.vmem %s468_s26, 1024  ;;  %p3252_p11 = scmp.lt.s32.totalorder %s468_s26, %s468_s26 }
  0x22   : > { %s4423_s28 = scalar_select %p3799_p3, 1, 0 }
  0x23   : > { %p3007_p5 = pneg %p3799_p3  ;;  %p3245_p8 = scmp.ne.s32.totalorder %s468_s26, %s3244_s20 }
  0x24   : > { %p3253_p12 = scmp.lt.s32.totalorder %s3244_s20, %s3244_s20 }
  0x25   : > { %p3808_p6 = pnand %p3007_p5, %p4401_p1 }
  0x26   : > { %p3254_p13 = por %p3253_p12, %p3252_p11 }
  0x27   : > { %s4424_s0 = scalar_select %p3808_p6, 1, 0 }
  0x28   : > { %p3818_p7 = pneg %p3808_p6 }
  0x2a   : > { %s4425_s19 = scalar_select %p3818_p7, 1, 0 }
  0x2b   : > { %p3247_p9 = pnand %p3245_p8, %p3818_p7 }
  0x2d   : > { %p3248_p10 = pneg %p3247_p9 }
  0x2f   : > { %p3255_p0 = pnand %p3254_p13, %p3248_p10 }
  0x31   : > { %3258 = shalt.err (!%p3255_p0)
}
  0x32   : > { %s4388_s25 = smov 64   ;;  %s4390_s29 = smov 4  }
  0x33   : > { %s4426_s6 = sld [smem:[#allocation44_spill]]  ;;  %s3270_s16 = scalar_lea.vmem %s3812_s30, 1024 }
  0x34   : > { %p3271_p2 = scmp.ne.s32.totalorder %s3812_s30, %s3270_s16  ;;  %p3278_p9 = scmp.lt.s32.totalorder %s3812_s30, %s3812_s30 }
  0x35   : > { %p3279_p10 = scmp.lt.s32.totalorder %s3270_s16, %s3270_s16 }
  0x36   : > { %p3273_p5 = pnand %p3271_p2, %p3818_p7 }
  0x37   : > { %p3280_p11 = por %p3279_p10, %p3278_p9 }
  0x38   : > { %p3274_p8 = pneg %p3273_p5 }
  0x39   : > { %3013 = dma.hbm_to_vmem [thread:$0]  (!%p3808_p6), %s4426_s6, 1024, %s468_s26, [#allocation11], %s4388_s25, %s4388_s25, %s4390_s29  }
  0x3a   : > { %p3281_p12 = pnand %p3280_p11, %p3274_p8 }
  0x3c   : > { %3284 = shalt.err (!%p3281_p12)
}
  0x3d   : > { %s4427_s7 = sld [smem:[#allocation45_spill]]  ;;  %s3296_s26 = scalar_lea.vmem %s3814_s18, 1024 }
  0x3e   : > { %p3297_p13 = scmp.ne.s32.totalorder %s3814_s18, %s3296_s26  ;;  %p3304_p5 = scmp.lt.s32.totalorder %s3814_s18, %s3814_s18 }
  0x3f   : > { %p3305_p8 = scmp.lt.s32.totalorder %s3296_s26, %s3296_s26 }
  0x40   : > { %p3299_p0 = pnand %p3297_p13, %p3818_p7 }
  0x41   : > { %p3306_p9 = por %p3305_p8, %p3304_p5 }
  0x42   : > { %p3300_p2 = pneg %p3299_p0 }
  0x43   : > { %3016 = dma.hbm_to_vmem [thread:$0]  (!%p3808_p6), %s4427_s7, 1024, %s3812_s30, [#allocation14], %s4388_s25, %s4388_s25, %s4390_s29  }
  0x44   : > { %p3307_p10 = pnand %p3306_p9, %p3300_p2 }
  0x46   : > { %3310 = shalt.err (!%p3307_p10)
}
  0x47   : > { %s4428_s11 = sld [smem:[#allocation48_spill]]  ;;  %s4392_s30 = sadd.s32 4294967294, %s3660_s24  }
  0x48   : > { %s3864_s20 = sadd.s32 1, %s3660_s24   ;;  %s74_s14 = sadd.s32 1, %s3656_s23 }
  0x49   : > { %4429 = sst [smem:[#allocation36_spill]] %s3864_s20  ;;  %s71_s26 = ssub.s32 %s3660_s24, %s3864_s20 }
  0x4a   : > { %p81_p11 = scmp.ne.s32.totalorder %s3656_s23, %s3652_s22  ;;  %p72_p12 = scmp.eq.s32.totalorder %s71_s26, 0 }
  0x4b   : > { %p82_p13 = scmp.eq.s32.totalorder %s3660_s24, 0  ;;  %p87_p0 = scmp.ne.s32.totalorder %s3652_s22, %s3648_s21 }
  0x4c   : > { %p378_p2 = scmp.eq.s32.totalorder %s3794_s27, 1  ;;  %p384_p10 = scmp.eq.s32.totalorder %s4392_s30, 1 }
  0x4d   : > { %3022 = dma.hbm_to_vmem [thread:$0]  (!%p3808_p6), %s4428_s11, 1024, %s3814_s18, [#allocation17], %s4388_s25, %s4388_s25, %s4390_s29  }
  0x4e   : > { %s3876_s16 = scalar_select %p72_p12, %s3656_s23, %s74_s14  }
  0x4f   : > { %p83_p5 = por %p82_p13, %p81_p11  ;;  %p3880_p8 = por %p4401_p1, %p87_p0 }
  0x50   : > { %4430 = sst [smem:[#allocation37_spill]] %s3876_s16  ;;  %p3884_p9 = por %p378_p2, %p81_p11 }
  0x51   : > { %s4431_s18 = scalar_select %p3880_p8, 1, 0 }
  0x52   : > { %s4433_s17 = scalar_select %p3884_p9, 1, 0 }
  0x53   : > { %4432 = sst [smem:[#allocation38_spill]] %s4431_s18  ;;  %p3059_p4 = scmp.lt.s32.totalorder %s3660_s24, 2 }
  0x54   : > { %4434 = sst [smem:[#allocation39_spill]] %s4433_s17  ;;  %s4393_s26 = sand.u32 1, %s3656_s23  }
  0x55   : > { %p3892_p3 = por %p384_p10, %p87_p0  ;;  %s3898_s14 = sshll.u32 %s4393_s26, 4 }
  0x56   : > { %s3901_s29 = sshll.u32 %s3660_s24, 8  ;;  %p3903_p12 = pnand %p3059_p4, %p83_p5 }
  0x57   : > { %s4435_s25 = scalar_select %p3892_p3, 1, 0 }
  0x58   : > { %s4402_s7 = sand.u32 1, %s3660_s24   ;;  %s4438_s2 = sld [smem:[#allocation42_spill]] }
  0x59   : > { %4436 = sst [smem:[#allocation40_spill]] %s4435_s25  ;;  %s577_s26 = scalar_lea.vmem [#allocation7], %s3898_s14 }
  0x5a   : > { %s584_s20 = sshll.u32 %s577_s26, 4  ;;  %s3919_s25 = scalar_lea.sflag [#allocation8], %s4402_s7  ;;  %s3915_s20 = int_to_ptr.vmem [resolvable:$true] %s584_s20 }
  0x5b   : > { %p3925_p11 = pneg %p3903_p12 }
  0x5e   : > { %s3912_s16 = scalar_lea.hbm %s4438_s2, %s3901_s29  ;;  %s3316_s26 = scalar_lea.hbm %s4438_s2, 512 }
  0x5f   : > { %s3311_s21 = scalar_lea.hbm %s3912_s16, 256  ;;  %p3317_p2 = scmp.lt.s32.totalorder %s3912_s16, %s4438_s2 }
  0x60   : > { %p3312_p4 = scmp.ne.s32.totalorder %s3912_s16, %s3311_s21  ;;  %p3318_p5 = scmp.lt.s32.totalorder %s3316_s26, %s3311_s21 }
  0x62   : > { %p3314_p13 = pnand %p3925_p11, %p3312_p4  ;;  %p3319_p10 = por %p3318_p5, %p3317_p2 }
  0x64   : > { %p3315_p0 = pneg %p3314_p13 }
  0x66   : > { %p3320_p1 = pnand %p3319_p10, %p3315_p0 }
  0x68   : > { %3323 = shalt.err (!%p3320_p1)
}
  0x69   : > { %s3324_s7 = scalar_lea.vmem %s3915_s20, 256  ;;  %s3667_s5 = smov [#allocation7]  }
  0x6a   : > { %p3325_p3 = scmp.ne.s32.totalorder %s3915_s20, %s3324_s7  ;;  %s3329_s11 = sshll.u32 %s3667_s5, 4  ;;  %s3330_s11 = int_to_ptr.vmem [resolvable:$false] %s3329_s11 }
  0x6b   : > { %s3331_s30 = scalar_lea.vmem %s3330_s11, 512  ;;  %p3332_p9 = scmp.lt.s32.totalorder %s3915_s20, %s3330_s11 }
  0x6c   : > { %p3327_p4 = pnand %p3325_p3, %p3925_p11  ;;  %p3333_p8 = scmp.lt.s32.totalorder %s3331_s30, %s3324_s7 }
  0x6e   : > { %p3328_p13 = pneg %p3327_p4  ;;  %p3334_p7 = por %p3333_p8, %p3332_p9 }
  0x70   : > { %p3335_p6 = pnand %p3334_p7, %p3328_p13 }
  0x72   : > { %3338 = shalt.err (!%p3335_p6)
}
  0x73   : > { %s3668_s9 = smov 128   ;;  %s3669_s21 = smov 8  }
  0x74   : > { %3035 = dma.hbm_to_vmem [thread:$0]  (!%p3903_p12), %s3912_s16, 256, %s3915_s20, %s3919_s25, %s3668_s9, %s3668_s9, %s3669_s21  }
  0x75   : > { %s3670_s5 = smov [#allocation2]   ;;  %p4440_p1 = scmp.ne.s32.totalorder %s4424_s0, 0 }
  0x76   : > { %s4441_s26 = sld [smem:[#allocation41_spill]]  ;;  %s3671_s11 = smov [#allocation15]  }
  0x77   : > { %s499_s30 = sshll.u32 %s3671_s11, 4  ;;  %s3672_s2 = smov [#allocation18]   ;;  %s500_s30 = int_to_ptr.vmem [resolvable:$true] %s499_s30 }
  0x78   : > { %s525_s8 = sshll.u32 %s3672_s2, 4  ;;  %s3361_s18 = scalar_lea.vmem %s500_s30, 1024  ;;  %s526_s8 = int_to_ptr.vmem [resolvable:$true] %s525_s8 }
  0x79   : > { %p3362_p3 = scmp.ne.s32.totalorder %s500_s30, %s3361_s18  ;;  %p4442_p6 = scmp.ne.s32.totalorder %s4425_s19, 0 }
  0x7a   : > { %p3369_p9 = scmp.lt.s32.totalorder %s500_s30, %s500_s30  ;;  %p3370_p0 = scmp.lt.s32.totalorder %s3361_s18, %s3361_s18 }
  0x7b   : > { %p3364_p7 = pnand %p3362_p3, %p4442_p6 }
  0x7c   : > { %3010 = dma.hbm_to_smem (!%p4440_p1), %s4441_s26, 16, %s3670_s5, [#allocation5]  }
  0x7d   : > { %p3365_p8 = pneg %p3364_p7  ;;  %p3371_p2 = por %p3370_p0, %p3369_p9 }
  0x7f   : > { %p3372_p5 = pnand %p3371_p2, %p3365_p8 }
  0x81   : > { %3375 = shalt.err (!%p3372_p5)
}
  0x82   : > { %s4443_s20 = smov 4   ;;  %s4444_s16 = smov 64  }
  0x83   : > { %3019 = dma.hbm_to_vmem [thread:$0]  (!%p4440_p1), %s4378_s10, 1024, %s500_s30, [#allocation14], %s4444_s16, %s4444_s16, %s4443_s20  }
  0x84   : > { %s3387_s2 = scalar_lea.vmem %s526_s8, 8192  ;;  %p3395_p3 = scmp.lt.s32.totalorder %s526_s8, %s526_s8 }
  0x85   : > { %p3388_p10 = scmp.ne.s32.totalorder %s526_s8, %s3387_s2  ;;  %p3396_p7 = scmp.lt.s32.totalorder %s3387_s2, %s3387_s2 }
  0x87   : > { %p3390_p4 = pnand %p3388_p10, %p4442_p6  ;;  %p3397_p8 = por %p3396_p7, %p3395_p3 }
  0x89   : > { %p3391_p13 = pneg %p3390_p4 }
  0x8b   : > { %p3398_p9 = pnand %p3397_p8, %p3391_p13 }
  0x8d   : > { %3401 = shalt.err (!%p3398_p9)
}
  0x8e   : > { %s3673_s18 = smov 512   ;;  %s3674_s7 = smov 32  }
  0x8f   : > { %3025 = dma.hbm_to_vmem [thread:$0]  (!%p4440_p1), %s4380_s12, 8192, %s526_s8, [#allocation17], %s3673_s18, %s3673_s18, %s3674_s7  }
  0x90   : > { %s3675_s30 = smov [#allocation19]  }
  0x91   : > { %s538_s5 = sshll.u32 %s3675_s30, 4  ;;  %s539_s5 = int_to_ptr.vmem [resolvable:$true] %s538_s5 }
  0x92   : > { %s3413_s17 = scalar_lea.vmem %s539_s5, 4096  ;;  %p3421_p10 = scmp.lt.s32.totalorder %s539_s5, %s539_s5 }
  0x93   : > { %p3414_p0 = scmp.ne.s32.totalorder %s539_s5, %s3413_s17  ;;  %p3422_p4 = scmp.lt.s32.totalorder %s3413_s17, %s3413_s17 }
  0x95   : > { %p3416_p2 = pnand %p3414_p0, %p4442_p6  ;;  %p3423_p13 = por %p3422_p4, %p3421_p10 }
  0x97   : > { %p3417_p5 = pneg %p3416_p2 }
  0x99   : > { %p3424_p3 = pnand %p3423_p13, %p3417_p5 }
  0x9b   : > { %3427 = shalt.err (!%p3424_p3)
}
  0x9c   : > { %3028 = dma.hbm_to_vmem [thread:$0]  (!%p4440_p1), %s4381_s13, 4096, %s539_s5, [#allocation20], %s4444_s16, %s4444_s16, %s4443_s20  }
  0x9d   : > { %s3987_s7 = scalar_lea.hbm %s4369_s1, %s3901_s29  ;;  %s556_s0 = scalar_lea.vmem [#allocation6], %s3898_s14 }
  0x9e   : > { %s563_s26 = sshll.u32 %s556_s0, 4  ;;  %s4445_s11 = sand.u32 1, %s3656_s23   ;;  %s3990_s26 = int_to_ptr.vmem [resolvable:$true] %s563_s26 }
  0x9f   : > { %s553_s30 = scalar_lea.sflag [#allocation3], %s4445_s11  ;;  %s3428_s17 = scalar_lea.hbm %s3987_s7, 256 }
  0xa0   : > { %p3429_p6 = scmp.ne.s32.totalorder %s3987_s7, %s3428_s17  ;;  %s3433_s5 = scalar_lea.hbm %s4369_s1, 512 }
  0xa1   : > { %p3434_p1 = scmp.lt.s32.totalorder %s3987_s7, %s4369_s1  ;;  %p3435_p9 = scmp.lt.s32.totalorder %s3433_s5, %s3428_s17 }
  0xa2   : > { %p3431_p7 = pnand %p3429_p6, %p3925_p11 }
  0xa3   : > { %p3436_p0 = por %p3435_p9, %p3434_p1 }
  0xa4   : > { %p3432_p8 = pneg %p3431_p7 }
  0xa6   : > { %p3437_p2 = pnand %p3436_p0, %p3432_p8 }
  0xa8   : > { %3440 = shalt.err (!%p3437_p2)
}
  0xa9   : > { %s3441_s19 = scalar_lea.vmem %s3990_s26, 256  ;;  %s3676_s18 = smov [#allocation6]  }
  0xaa   : > { %p3442_p5 = scmp.ne.s32.totalorder %s3990_s26, %s3441_s19  ;;  %s3446_s0 = sshll.u32 %s3676_s18, 4  ;;  %s3447_s0 = int_to_ptr.vmem [resolvable:$false] %s3446_s0 }
  0xab   : > { %s3448_s11 = scalar_lea.vmem %s3447_s0, 512  ;;  %p3449_p13 = scmp.lt.s32.totalorder %s3990_s26, %s3447_s0 }
  0xac   : > { %p3444_p10 = pnand %p3442_p5, %p3925_p11  ;;  %p3450_p3 = scmp.lt.s32.totalorder %s3448_s11, %s3441_s19 }
  0xae   : > { %p3445_p4 = pneg %p3444_p10  ;;  %p3451_p6 = por %p3450_p3, %p3449_p13 }
  0xb0   : > { %p3452_p7 = pnand %p3451_p6, %p3445_p4 }
  0xb2   : > { %3455 = shalt.err (!%p3452_p7)
}
  0xb3   : > { %3032 = dma.hbm_to_vmem [thread:$0]  (!%p3903_p12), %s3987_s7, 256, %s3990_s26, %s553_s30, %s3668_s9, %s3668_s9, %s3669_s21  }
  0xb4   : > { %s4021_s16 = scalar_lea.hbm %s4371_s3, %s3901_s29  ;;  %s598_s5 = scalar_lea.vmem [#allocation9], %s3898_s14 }
  0xb5   : > { %s605_s2 = sshll.u32 %s598_s5, 4  ;;  %s3456_s8 = scalar_lea.hbm %s4021_s16, 256  ;;  %s606_s2 = int_to_ptr.vmem [resolvable:$true] %s605_s2 }
  0xb6   : > { %p3457_p8 = scmp.ne.s32.totalorder %s4021_s16, %s3456_s8  ;;  %s3461_s7 = scalar_lea.hbm %s4371_s3, 512 }
  0xb7   : > { %p3462_p0 = scmp.lt.s32.totalorder %s4021_s16, %s4371_s3  ;;  %p3463_p2 = scmp.lt.s32.totalorder %s3461_s7, %s3456_s8 }
  0xb8   : > { %p3459_p1 = pnand %p3457_p8, %p3925_p11 }
  0xb9   : > { %p3464_p5 = por %p3463_p2, %p3462_p0 }
  0xba   : > { %p3460_p9 = pneg %p3459_p1 }
  0xbc   : > { %p3465_p10 = pnand %p3464_p5, %p3460_p9 }
  0xbe   : > { %3468 = shalt.err (!%p3465_p10)
}
  0xbf   : > { %s3469_s0 = scalar_lea.vmem %s606_s2, 256  ;;  %s3677_s11 = smov [#allocation9]  }
  0xc0   : > { %p3470_p4 = scmp.ne.s32.totalorder %s606_s2, %s3469_s0  ;;  %s3474_s17 = sshll.u32 %s3677_s11, 4  ;;  %s3475_s17 = int_to_ptr.vmem [resolvable:$false] %s3474_s17 }
  0xc1   : > { %s3476_s20 = scalar_lea.vmem %s3475_s17, 512  ;;  %p3477_p6 = scmp.lt.s32.totalorder %s606_s2, %s3475_s17 }
  0xc2   : > { %p3472_p13 = pnand %p3470_p4, %p3925_p11  ;;  %p3478_p7 = scmp.lt.s32.totalorder %s3476_s20, %s3469_s0 }
  0xc4   : > { %p3473_p3 = pneg %p3472_p13  ;;  %p3479_p8 = por %p3478_p7, %p3477_p6 }
  0xc6   : > { %p3480_p1 = pnand %p3479_p8, %p3473_p3 }
  0xc8   : > { %3483 = shalt.err (!%p3480_p1)
}
  0xc9   : > { %3038 = dma.hbm_to_vmem [thread:$0]  (!%p3903_p12), %s4021_s16, 256, %s606_s2, %s3919_s25, %s3668_s9, %s3668_s9, %s3669_s21  }
  0xca   : > { %s4048_s19 = scalar_lea.hbm %s4372_s4, %s3901_s29  ;;  %s619_s18 = scalar_lea.vmem [#allocation10], %s3898_s14 }
  0xcb   : > { %s626_s7 = sshll.u32 %s619_s18, 4  ;;  %s4446_s26 = sand.u32 1, %s3660_s24   ;;  %s4051_s7 = int_to_ptr.vmem [resolvable:$true] %s626_s7 }
  0xcc   : > { %s616_s30 = scalar_lea.sflag [#allocation11], %s4446_s26  ;;  %s3484_s0 = scalar_lea.hbm %s4048_s19, 256 }
  0xcd   : > { %p3485_p9 = scmp.ne.s32.totalorder %s4048_s19, %s3484_s0  ;;  %s3489_s2 = scalar_lea.hbm %s4372_s4, 512 }
  0xce   : > { %p3490_p5 = scmp.lt.s32.totalorder %s4048_s19, %s4372_s4  ;;  %p3491_p10 = scmp.lt.s32.totalorder %s3489_s2, %s3484_s0 }
  0xcf   : > { %p3487_p0 = pnand %p3485_p9, %p3925_p11 }
  0xd0   : > { %p3492_p4 = por %p3491_p10, %p3490_p5 }
  0xd1   : > { %p3488_p2 = pneg %p3487_p0 }
  0xd3   : > { %p3493_p13 = pnand %p3492_p4, %p3488_p2 }
  0xd5   : > { %3496 = shalt.err (!%p3493_p13)
}
  0xd6   : > { %s3497_s14 = scalar_lea.vmem %s4051_s7, 256  ;;  %s3678_s17 = smov [#allocation10]  }
  0xd7   : > { %p3498_p3 = scmp.ne.s32.totalorder %s4051_s7, %s3497_s14  ;;  %s3502_s20 = sshll.u32 %s3678_s17, 4  ;;  %s3503_s20 = int_to_ptr.vmem [resolvable:$false] %s3502_s20 }
  0xd8   : > { %s3504_s5 = scalar_lea.vmem %s3503_s20, 512  ;;  %p3505_p8 = scmp.lt.s32.totalorder %s4051_s7, %s3503_s20 }
  0xd9   : > { %p3500_p6 = pnand %p3498_p3, %p3925_p11  ;;  %p3506_p1 = scmp.lt.s32.totalorder %s3504_s5, %s3497_s14 }
  0xdb   : > { %p3501_p7 = pneg %p3500_p6  ;;  %p3507_p9 = por %p3506_p1, %p3505_p8 }
  0xdd   : > { %p3508_p0 = pnand %p3507_p9, %p3501_p7 }
  0xdf   : > { %3511 = shalt.err (!%p3508_p0)
}
  0xe0   : > { %3041 = dma.hbm_to_vmem [thread:$0]  (!%p3903_p12), %s4048_s19, 256, %s4051_s7, %s616_s30, %s3668_s9, %s3668_s9, %s3669_s21  }
  0xe1   : > { %p4447_p11 = scmp.ne.s32.totalorder %s4423_s28, 0 }
  0xe2   : > { %p4448_p2 = scmp.eq.s32.totalorder (!%p4447_p11), %s3794_s27, 0 }
  0xe3   : > { %638 = sbr.rel (%p4447_p11) target bundleno = 2287 (0x8ef), region = 76 }
  0xe8   : > { %3607 = dma.done.wait (%p4448_p2), [#allocation5], 16   ;;  %p4449_p5 = pmov %p4448_p2 }
  0xe9   : > { %s4450_s15 = sld [smem:[#allocation38_spill]]  ;;  %s4085_s8 = sand.u32 1, %s3652_s22  }
  0xea   : > { %3609 = vsyncadd (%p4449_p5), [#allocation5], 4294967280  ;;  %s4088_s6 = sshll.u32 %s4085_s8, 4  ;;  %s645_s18 = scalar_lea.sflag [#allocation3], %s4085_s8 }
  0xeb   : > { %s648_s9 = scalar_lea.vmem [#allocation6], %s4088_s6 }
  0xef   : > { %p4451_p12 = scmp.ne.s32.totalorder %s4450_s15, 0 }
  0xf1   : > { %3611 = dma.done.wait (%p4451_p12), %s645_s18, 256  }
  0xf2   : > { %3613 = vsyncadd (%p4451_p12), %s645_s18, 4294967040  ;;  %s4097_s28 = sand.u32 1, %s3794_s27   ;;  %s657_s19 = scalar_lea.vmem [#allocation7], %s4088_s6 }
  0xf3   : > { %s654_s21 = scalar_lea.sflag [#allocation8], %s4097_s28 }
  0xf4   : > { %3615 = dma.done.wait (%p4451_p12), %s654_s21, 512  }
  0xf5   : > { %3617 = vsyncadd (%p4451_p12), %s654_s21, 4294966784  ;;  %s666_s7 = scalar_lea.vmem [#allocation9], %s4088_s6  ;;  %s672_s26 = scalar_lea.sflag [#allocation11], %s4097_s28 }
  0xf6   : > { %s675_s30 = scalar_lea.vmem [#allocation10], %s4088_s6 }
  0xf7   : > { %3619 = dma.done.wait (%p4451_p12), %s672_s26, 256  }
  0xf8   : > { %3621 = vsyncadd (%p4451_p12), %s672_s26, 4294967040  ;;  %p4452_p10 = pmov %p4448_p2 }
  0xf9   : > { %p4453_p4 = pmov %p4448_p2 }
  0xfa   : > { %3623 = dma.done.wait (%p4452_p10), [#allocation11], 1024  }
  0xfb   : > { %3625 = vsyncadd (%p4453_p4), [#allocation11], 4294966272  ;;  %p4454_p13 = pmov %p4448_p2 }
  0xfc   : > { %p4455_p3 = pmov %p4448_p2 }
  0xfd   : > { %3627 = dma.done.wait (%p4454_p13), [#allocation14], 2048  }
  0xfe   : > { %3629 = vsyncadd (%p4455_p3), [#allocation14], 4294965248  ;;  %p4456_p6 = pmov %p4448_p2 }
  0xff   : > { %p4457_p7 = pmov %p4448_p2 }
 0x100   : > { %3631 = dma.done.wait (%p4456_p6), [#allocation17], 9216  }
 0x101   : > { %3633 = vsyncadd (%p4457_p7), [#allocation17], 4294958080  ;;  %p4458_p8 = pmov %p4448_p2 }
 0x102   : > { %p4459_p1 = pmov %p4448_p2 }
 0x103   : > { %3635 = dma.done.wait (%p4458_p8), [#allocation20], 4096  }
 0x104   : > { %3637 = vsyncadd (%p4459_p1), [#allocation20], 4294963200 }
 0x105   : > { %704 = sfence }
 0x106   : > { %v4128_v0 = vld [vmem:[%s648_s9] sm:$0xff]  ;;  %v4130_v1 = vld [vmem:[%s648_s9 + $0x8] sm:$0xff]  ;;  %v3679_v3 = vmov 0.0   ;;  %vm3680_vm0 = vmmov 0   ;;  %s4460_s16 = sld [smem:[#allocation46_spill]]  ;;  %s3681_s29 = smov 64  }
 0x107   : > { %v791_v2 = vmul.f32 %v4128_v0, %v4128_v0  ;;  %2883 = vmatprep.subr.bf16.mxu0 %v3679_v3  ;;  %v3119_v4 = vld [vmem:[#allocation15 + $0x38] sm:$0xff]   ;;  %2903 = vmatprep.subr.bf16.mxu1 %v3679_v3  ;;  %v792_v5 = vmul.f32 %v4130_v1, %v4130_v1  ;;  %v3120_v6 = vld [vmem:[#allocation15 + $0x30] sm:$0xff]   ;;  %v3121_v7 = vld [vmem:[#allocation15 + $0x28] sm:$0xff]   ;;  %s782_s2 = sld [smem:[#allocation2]]  ;;  %s4180_s17 = scalar_lea.vmem [#allocation22], %s4088_s6 }
 0x108   : > { %2884 = vmatpush3.bf16.msra.mxu0 %v3119_v4  ;;  %v3122_v8 = vld [vmem:[#allocation15 + $0x20] sm:$0xff]   ;;  %v3123_v9 = vld [vmem:[#allocation15 + $0x18] sm:$0xff]   ;;  %2899 = vmatprep.mubr.msk.bf16.mxu0 %vm3680_vm0, %v3679_v3  ;;  %v3124_v10 = vld [vmem:[#allocation15 + $0x10] sm:$0xff]   ;;  %s2653_s11 = sld [smem:[#allocation2 + $0x2]]  ;;  %s4201_s18 = scalar_lea.vmem [#allocation24], %s4088_s6 }
 0x109   : > { %793 = vadd.xlane.f32.xlu0 %v791_v2  ;;  %2885 = vmatprep.subr.bf16.mxu0 %v3679_v3  ;;  %v3125_v11 = vld [vmem:[#allocation15 + $0x8] sm:$0xff]   ;;  %v3126_v12 = vld [vmem:[#allocation15] sm:$0xff]   ;;  %v3127_v27 = vld [vmem:[#allocation12 + $0x38] sm:$0xff]   ;;  %s4461_s15 = sld [smem:[#allocation43_spill]]  ;;  %s4251_s0 = sshll.u32 %s3794_s27, 8 }
 0x10a   : > { %2919 = vmatprep.mubr.msk.bf16.mxu1 %vm3680_vm0, %v3679_v3  ;;  %2904 = vmatpush3.bf16.msra.mxu1 %v3127_v27  ;;  %v3128_v28 = vld [vmem:[#allocation12 + $0x30] sm:$0xff]   ;;  %v3129_v29 = vld [vmem:[#allocation12 + $0x28] sm:$0xff]   ;;  %v3130_v30 = vld [vmem:[#allocation12 + $0x20] sm:$0xff]   ;;  %s2652_s9 = sld [smem:[#allocation2 + $0x1]] }
 0x10b   : > { %2905 = vmatprep.subr.bf16.mxu1 %v3679_v3  ;;  %v3131_v31 = vld [vmem:[#allocation12 + $0x18] sm:$0xff]   ;;  %v3132_v32 = vld [vmem:[#allocation12 + $0x10] sm:$0xff]   ;;  %v3133_v33 = vld [vmem:[#allocation12 + $0x8] sm:$0xff]   ;;  %s4463_s26 = sld [smem:[#allocation39_spill]] }
 0x10c   : > { %2886 = vmatpush3.bf16.msra.mxu0 %v3120_v6  ;;  %v2654_v22 = vld [vmem:[%s4460_s16] ss:$0 sm:$0xff]  ;;  %v921_v44 = vld [vmem:[%s657_s19 + $0x8] sm:$0xff] }
 0x10d   : > { %795 = vadd.xlane.f32.xlu0 %v792_v5  ;;  %2887 = vmatprep.subr.bf16.mxu0 %v3679_v3  ;;  %v3134_v34 = vld [vmem:[#allocation12] sm:$0xff]   ;;  %v785_v38 = vstv %s782_s2  ;;  %v923_v45 = vld [vmem:[%s666_s7 + $0x8] sm:$0xff]  ;;  %s4464_s2 = sld [smem:[#allocation50_spill]] }
 0x10e   : > { %2906 = vmatpush3.bf16.msra.mxu1 %v3128_v28  ;;  %v922_v41 = vld [vmem:[%s666_s7] sm:$0xff]  ;;  %v1044_v55 = vstv %s2653_s11  ;;  %v1043_v58 = vld [vmem:[%s675_s30 + $0x8] sm:$0xff]  ;;  %s4462_s7 = sld [smem:[#allocation47_spill]]  ;;  %s2296_s11 = scalar_lea.sflag [#allocation23], %s4097_s28 }
 0x10f   : > { %2907 = vmatprep.subr.bf16.mxu1 %v3679_v3  ;;  %v920_v43 = vld [vmem:[%s657_s19] sm:$0xff]  ;;  %v1046_v63 = vmul.f32 %v1044_v55, %v1043_v58  ;;  %v3143_v28 = vld [vmem:[#allocation16 + $0x38] sm:$0xff]  }
 0x110   : > { %2888 = vmatpush3.bf16.msra.mxu0 %v3121_v7  ;;  %v1042_v54 = vld [vmem:[%s675_s30] sm:$0xff]  ;;  %s2330_s30 = sshll.u32 %s4180_s17, 4  ;;  %s4248_s30 = int_to_ptr.vmem [resolvable:$true] %s2330_s30 }
 0x111   : > { %2889 = vmatprep.subr.bf16.mxu0 %v3679_v3  ;;  %v1045_v56 = vmul.f32 %v1044_v55, %v1042_v54  ;;  %v2671_v4 = vld [vmem:[%s4461_s15] ss:$0 sm:$0xff]  ;;  %p4465_p0 = scmp.ne.s32.totalorder %s4463_s26, 0 }
 0x112   : > { %2908 = vmatpush3.bf16.msra.mxu1 %v3129_v29  ;;  %v3142_v27 = vld [vmem:[#allocation13] sm:$0xff]   ;;  %v3144_v29 = vld [vmem:[#allocation16 + $0x30] sm:$0xff]  }
 0x113   : > { %2909 = vmatprep.subr.bf16.mxu1 %v3679_v3  ;;  %v1368_v54 = vld [vmem:[#allocation18 + $0x180] sm:$0xff] }
 0x114   : > { %2890 = vmatpush3.bf16.msra.mxu0 %v3122_v8  ;;  %v1372_v55 = vld [vmem:[#allocation18 + $0x1a0] sm:$0xff] }
 0x115   : > { %2891 = vmatprep.subr.bf16.mxu0 %v3679_v3  ;;  %v2738_v58 = vcombine.high %v1368_v54, %v1372_v55 }
 0x116   : > { %2910 = vmatpush3.bf16.msra.mxu1 %v3130_v30  ;;  %v3145_v30 = vld [vmem:[#allocation16 + $0x28] sm:$0xff]  }
 0x117   : > { %2911 = vmatprep.subr.bf16.mxu1 %v3679_v3 }
 0x118   : > { %2892 = vmatpush3.bf16.msra.mxu0 %v3123_v9 }
 0x119   : > { %2893 = vmatprep.subr.bf16.mxu0 %v3679_v3 }
 0x11a   : > { %2912 = vmatpush3.bf16.msra.mxu1 %v3131_v31  ;;  %v3146_v31 = vld [vmem:[#allocation16 + $0x20] sm:$0xff]  }
 0x11b   : > { %2913 = vmatprep.subr.bf16.mxu1 %v3679_v3 }
 0x11c   : > { %2894 = vmatpush3.bf16.msra.mxu0 %v3124_v10 }
 0x11d   : > { %2895 = vmatprep.subr.bf16.mxu0 %v3679_v3 }
 0x11e   : > { %2914 = vmatpush3.bf16.msra.mxu1 %v3132_v32  ;;  %v3147_v32 = vld [vmem:[#allocation16 + $0x18] sm:$0xff]  }
 0x11f   : > { %2915 = vmatprep.subr.bf16.mxu1 %v3679_v3 }
 0x120   : > { %2896 = vmatpush3.bf16.msra.mxu0 %v3125_v11 }
 0x121   : > { %2897 = vmatprep.subr.bf16.mxu0 %v3679_v3 }
 0x122   : > { %2916 = vmatpush3.bf16.msra.mxu1 %v3133_v33  ;;  %v3148_v33 = vld [vmem:[#allocation16 + $0x10] sm:$0xff]  }
 0x123   : > { %2917 = vmatprep.subr.bf16.mxu1 %v3679_v3 }
 0x124   : > { %2898 = vmatpush3.bf16.msra.mxu0 %v3126_v12  ;;  %v3135_v12 = vld [vmem:[#allocation13 + $0x38] sm:$0xff]  }
 0x125   : > { %2923 = vmatprep.subr.bf16.mxu0 %v3679_v3 }
 0x126   : > { %2918 = vmatpush3.bf16.msra.mxu1 %v3134_v34 }
 0x127   : > { %2943 = vmatprep.subr.bf16.mxu1 %v3679_v3 }
 0x192   : > { %v794_v13 = vpop.xlane.xlu0 %793 }
 0x193   : > { %v798_v14 = vmul.f32 0.0078125, %v794_v13  ;;  %v3136_v13 = vld [vmem:[#allocation13 + $0x30] sm:$0xff]  }
 0x195   : > { %v800_v15 = vadd.f32 1e-06, %v798_v14  ;;  %v3137_v14 = vld [vmem:[#allocation13 + $0x28] sm:$0xff]  }
 0x196   : > { %v796_v16 = vpop.xlane.xlu0 %795 }
 0x197   : > { %3183 = vrsqrt.f32 %v800_v15  ;;  %v799_v17 = vmul.f32 0.0078125, %v796_v16 }
 0x199   : > { %v801_v18 = vadd.f32 1e-06, %v799_v17 }
 0x19b   : > { %3185 = vrsqrt.f32 %v801_v18 }
 0x19c   : > { %3187 = vrcp.f32 %v785_v38 }
 0x1a4   : > { %v3184_v19 = vpop.eup %3183 }
 0x1a5   : > { %v804_v20 = vmul.f32 %v3184_v19, %v4128_v0 }
 0x1a7   : > { %v812_v24 = vmul.f32 %v2654_v22, %v804_v20 }
 0x1a8   : > { %v3186_v21 = vpop.eup %3185 }
 0x1a9   : > { %v805_v23 = vmul.f32 %v3186_v21, %v4130_v1  ;;  %v3188_v40 = vpop.eup %3187 }
 0x1aa   : > { %2963 = vpush %v3188_v40 }
 0x1ab   : > { %v813_v25 = vmul.f32 %v2654_v22, %v805_v23  ;;  %v3138_v23 = vld [vmem:[#allocation13 + $0x20] sm:$0xff]  }
 0x1ad   : > { %v814_v26 = vpack.c.bf16 %v813_v25, %v812_v24  ;;  %v3139_v24 = vld [vmem:[#allocation13 + $0x18] sm:$0xff]   ;;  %v3140_v25 = vld [vmem:[#allocation13 + $0x10] sm:$0xff]  }
 0x1af   : > { %2900 = vmatmul.mubr.bf16.vlgmr.msra.gmra.mxu0 %v814_v26  ;;  %v3141_v26 = vld [vmem:[#allocation13 + $0x8] sm:$0xff]  }
 0x1b0   : > { %2939 = vmatprep.mubr.msk.bf16.mxu0 %vm3680_vm0, %v3679_v3  ;;  %2924 = vmatpush3.bf16.msra.mxu0 %v3135_v12 }
 0x1b1   : > { %2925 = vmatprep.subr.bf16.mxu0 %v3679_v3 }
 0x1b4   : > { %2926 = vmatpush3.bf16.msra.mxu0 %v3136_v13  ;;  %v1360_v13 = vld [vmem:[#allocation18 + $0x140] sm:$0xff] }
 0x1b5   : > { %2927 = vmatprep.subr.bf16.mxu0 %v3679_v3 }
 0x1b8   : > { %2928 = vmatpush3.bf16.msra.mxu0 %v3137_v14  ;;  %v1361_v14 = vld [vmem:[#allocation18 + $0x148] sm:$0xff] }
 0x1b9   : > { %2929 = vmatprep.subr.bf16.mxu0 %v3679_v3 }
 0x1bc   : > { %2930 = vmatpush3.bf16.msra.mxu0 %v3138_v23  ;;  %v1357_v23 = vld [vmem:[#allocation18 + $0x128] sm:$0xff] }
 0x1bd   : > { %2931 = vmatprep.subr.bf16.mxu0 %v3679_v3 }
 0x1c0   : > { %2932 = vmatpush3.bf16.msra.mxu0 %v3139_v24 }
 0x1c1   : > { %2933 = vmatprep.subr.bf16.mxu0 %v3679_v3 }
 0x1c4   : > { %2934 = vmatpush3.bf16.msra.mxu0 %v3140_v25 }
 0x1c5   : > { %2935 = vmatprep.subr.bf16.mxu0 %v3679_v3 }
 0x1c8   : > { %2936 = vmatpush3.bf16.msra.mxu0 %v3141_v26 }
 0x1c9   : > { %2937 = vmatprep.subr.bf16.mxu0 %v3679_v3 }
 0x1cc   : > { %2938 = vmatpush3.bf16.msra.mxu0 %v3142_v27  ;;  %v1344_v27 = vld [vmem:[#allocation18 + $0xc0] sm:$0xff] }
 0x1db   : > { %s2964_s14 = spop %2963 }
 0x1dc   : > { %v1049_v61 = vstv %s2964_s14  ;;  %s3512_s14 = scalar_lea.vmem %s4248_s30, 256 }
 0x1dd   : > { %p3513_p9 = scmp.ne.s32.totalorder %s4248_s30, %s3512_s14 }
 0x1df   : > { %p3514_p11 = pnand %p3513_p9, %p4465_p0 }
 0x1e1   : > { %p3515_p2 = pneg %p3514_p11 }
 0x26f   : > { %v913_v35 = vpop.f32.mrf.mxu0 }
 0x270   : > { %926 = vrot.lane.b32.xlu1 %v913_v35, %s3681_s29  ;;  %v924_v48 = vmul.f32 %v920_v43, %v913_v35 }
 0x271   : > { %v2901_v36 = vpop.f32.mrf.mxu0 }
 0x273   : > { %v916_v37 = vpop.f32.mrf.mxu0 }
 0x274   : > { %928 = vrot.lane.b32.xlu1 %v916_v37, %s3681_s29  ;;  %v925_v49 = vmul.f32 %v921_v44, %v916_v37  ;;  %s4257_s29 = scalar_lea.hbm %s4464_s2, %s4251_s0 }
 0x275   : > { %v2902_v39 = vpop.f32.mrf.mxu0 }
 0x2e2   : > { %v927_v42 = vpop.permute.xlu1 %926 }
 0x2e3   : > { %v930_v46 = vmul.f32 %v927_v42, %v922_v41  ;;  %v3149_v41 = vld [vmem:[#allocation16 + $0x8] sm:$0xff]   ;;  %v3150_v42 = vld [vmem:[#allocation16] sm:$0xff]  }
 0x2e5   : > { %v932_v51 = vadd.f32 %v930_v46, %v924_v48  ;;  %v1376_v48 = vld [vmem:[#allocation18 + $0x1c0] sm:$0xff] }
 0x2e6   : > { %v929_v47 = vpop.permute.xlu1 %928 }
 0x2e7   : > { %v931_v50 = vmul.f32 %v929_v47, %v923_v45 }
 0x2e9   : > { %v933_v52 = vadd.f32 %v931_v50, %v925_v49  ;;  %v1380_v49 = vld [vmem:[#allocation18 + $0x1e0] sm:$0xff]  ;;  %v1377_v50 = vld [vmem:[#allocation18 + $0x1c8] sm:$0xff] }
 0x2eb   : > { %v934_v53 = vpack.c.bf16 %v933_v52, %v932_v51  ;;  %v2745_v51 = vcombine.low %v1376_v48, %v1380_v49  ;;  %v2746_v52 = vcombine.high %v1376_v48, %v1380_v49  ;;  %v1320_v49 = vld [vmem:[#allocation18] sm:$0xff] }
 0x2ed   : > { %2920 = vmatmul.mubr.bf16.vlgmr.msra.gmra.mxu1 %v934_v53  ;;  %v1381_v53 = vld [vmem:[#allocation18 + $0x1e8] sm:$0xff]  ;;  %1704 = vmatprep.subr.bf16.mxu0 %v2746_v52 }
 0x2ee   : > { %2959 = vmatprep.mubr.msk.bf16.mxu1 %vm3680_vm0, %v3679_v3  ;;  %2944 = vmatpush3.bf16.msra.mxu1 %v3143_v28  ;;  %v1348_v28 = vld [vmem:[#allocation18 + $0xe0] sm:$0xff] }
 0x2ef   : > { %2945 = vmatprep.subr.bf16.mxu1 %v3679_v3 }
 0x2f2   : > { %2946 = vmatpush3.bf16.msra.mxu1 %v3144_v29  ;;  %v1345_v29 = vld [vmem:[#allocation18 + $0xc8] sm:$0xff] }
 0x2f3   : > { %2947 = vmatprep.subr.bf16.mxu1 %v3679_v3 }
 0x2f6   : > { %2948 = vmatpush3.bf16.msra.mxu1 %v3145_v30  ;;  %v2713_v30 = vcombine.low %v1344_v27, %v1348_v28 }
 0x2f7   : > { %2949 = vmatprep.subr.bf16.mxu1 %v3679_v3 }
 0x2fa   : > { %2950 = vmatpush3.bf16.msra.mxu1 %v3146_v31  ;;  %v2714_v31 = vcombine.high %v1344_v27, %v1348_v28  ;;  %v1366_v27 = vld [vmem:[#allocation18 + $0x170] sm:$0xff]  ;;  %v1363_v28 = vld [vmem:[#allocation18 + $0x158] sm:$0xff] }
 0x2fb   : > { %2951 = vmatprep.subr.bf16.mxu1 %v3679_v3 }
 0x2fe   : > { %2952 = vmatpush3.bf16.msra.mxu1 %v3147_v32  ;;  %v1349_v32 = vld [vmem:[#allocation18 + $0xe8] sm:$0xff] }
 0x2ff   : > { %2953 = vmatprep.subr.bf16.mxu1 %v3679_v3 }
 0x302   : > { %2954 = vmatpush3.bf16.msra.mxu1 %v3148_v33  ;;  %v1336_v33 = vld [vmem:[#allocation18 + $0x80] sm:$0xff] }
 0x303   : > { %2955 = vmatprep.subr.bf16.mxu1 %v3679_v3 }
 0x306   : > { %2956 = vmatpush3.bf16.msra.mxu1 %v3149_v41  ;;  %v1328_v41 = vld [vmem:[#allocation18 + $0x40] sm:$0xff] }
 0x307   : > { %2957 = vmatprep.subr.bf16.mxu1 %v3679_v3  ;;  %v1369_v3 = vld [vmem:[#allocation18 + $0x188] sm:$0xff] }
 0x30a   : > { %2958 = vmatpush3.bf16.msra.mxu1 %v3150_v42 }
 0x3ad   : > { %v1033_v57 = vpop.f32.mrf.mxu1 }
 0x3ae   : > { %v1040_v59 = vmul.f32 0.088388346, %v1033_v57  ;;  %v2748_v57 = vcombine.high %v1377_v50, %v1381_v53 }
 0x3af   : > { %v2921_v60 = vpop.f32.mrf.mxu1 }
 0x3b0   : > { %v1047_v62 = vadd.f32 %v1045_v56, %v1040_v59  ;;  %2286 = vst [vmem:[%s4180_s17] sm:$0xff] %v1040_v59  ;;  %v2747_v56 = vcombine.low %v1377_v50, %v1381_v53  ;;  %v1373_v59 = vld [vmem:[#allocation18 + $0x1a8] sm:$0xff]  ;;  %1747 = vmatprep.subr.bf16.mxu1 %v2748_v57  ;;  %v1378_v50 = vld [vmem:[#allocation18 + $0x1d0] sm:$0xff]  ;;  %v1324_v53 = vld [vmem:[#allocation18 + $0x20] sm:$0xff] }
 0x3b1   : > { %v1036_v2 = vpop.f32.mrf.mxu1  ;;  %v2740_v60 = vcombine.high %v1369_v3, %v1373_v59  ;;  %v1321_v57 = vld [vmem:[#allocation18 + $0x8] sm:$0xff] }
 0x3b2   : > { %v1050_v5 = vmul.f32 %v1049_v61, %v1047_v62  ;;  %v1041_v6 = vmul.f32 0.088388346, %v1036_v2  ;;  %v2739_v62 = vcombine.low %v1369_v3, %v1373_v59 }
 0x3b3   : > { %v2922_v7 = vpop.f32.mrf.mxu1 }
 0x3b4   : > { %v1048_v8 = vadd.f32 %v1046_v63, %v1041_v6  ;;  %2287 = vst [vmem:[%s4180_s17 + $0x8] sm:$0xff] %v1041_v6  ;;  %v1059_v9 = vadd.f32 %v2671_v4, %v1050_v5  ;;  %v1291_v63 = vstv %s2652_s9  ;;  %s3683_s17 = smov [#allocation22]  }
 0x3b5   : > { %v1292_v2 = vmul.f32 %v1291_v63, %v4128_v0  ;;  %v1293_v6 = vmul.f32 %v1291_v63, %v4130_v1  ;;  %v1364_v0 = vld [vmem:[#allocation18 + $0x160] sm:$0xff]  ;;  %v2689_v63 = vcombine.low %v1320_v49, %v1324_v53  ;;  %s3516_s20 = sshll.u32 %s3683_s17, 4  ;;  %s3517_s20 = int_to_ptr.vmem [resolvable:$false] %s3516_s20 }
 0x3b6   : > { %1061 = vmax.xlane.f32.xlu0 %v1059_v9  ;;  %v1051_v10 = vmul.f32 %v1049_v61, %v1048_v8  ;;  %v2737_v61 = vcombine.low %v1368_v54, %v1372_v55  ;;  %v1379_v55 = vld [vmem:[#allocation18 + $0x1d8] sm:$0xff]  ;;  %s3518_s5 = scalar_lea.vmem %s3517_s20, 512  ;;  %p3519_p5 = scmp.lt.s32.totalorder %s4248_s30, %s3517_s20 }
 0x3b7   : > { %p3520_p12 = scmp.lt.s32.totalorder %s3518_s5, %s3512_s14 }
 0x3b8   : > { %v1060_v11 = vadd.f32 %v2671_v4, %v1051_v10 }
 0x3b9   : > { %p3521_p10 = por %p3520_p12, %p3519_p5 }
 0x3ba   : > { %1063 = vmax.xlane.f32.xlu1 %v1060_v11 }
 0x3bb   : > { %p3522_p4 = pnand %p3521_p10, %p3515_p2 }
 0x43f   : > { %v1062_v15 = vpop.xlane.xlu0 %1061 }
 0x440   : > { %v1065_v16 = vsub.f32 %v1059_v9, %v1062_v15  ;;  %v2730_v15 = vcombine.high %v1360_v13, %v1364_v0 }
 0x442   : > { %v1067_v17 = vmul.f32 1.442695, %v1065_v16  ;;  %v1365_v16 = vld [vmem:[#allocation18 + $0x168] sm:$0xff] }
 0x443   : > { %v1064_v18 = vpop.xlane.xlu1 %1063  ;;  %v2731_v1 = vcombine.low %v1361_v14, %v1365_v16 }
 0x444   : > { %3189 = vpow2.f32 %v1067_v17  ;;  %v1066_v19 = vsub.f32 %v1060_v11, %v1064_v18  ;;  %v2729_v17 = vcombine.low %v1360_v13, %v1364_v0  ;;  %v2732_v18 = vcombine.high %v1361_v14, %v1365_v16  ;;  %v2688_v16 = vld [vmem:[%s4462_s7] ss:$0 sm:$0xff] }
 0x446   : > { %v1069_v20 = vmul.f32 1.442695, %v1066_v19  ;;  %v1352_v19 = vld [vmem:[#allocation18 + $0x100] sm:$0xff] }
 0x448   : > { %3191 = vpow2.f32 %v1069_v20  ;;  %v1356_v20 = vld [vmem:[#allocation18 + $0x120] sm:$0xff] }
 0x449   : > { %v2721_v24 = vcombine.low %v1352_v19, %v1356_v20 }
 0x451   : > { %v3190_v21 = vpop.eup %3189 }
 0x452   : > { %1071 = vadd.xlane.f32.xlu0 %v3190_v21 }
 0x455   : > { %v3192_v22 = vpop.eup %3191 }
 0x456   : > { %1073 = vadd.xlane.f32.xlu0 %v3192_v22 }
 0x4db   : > { %v1072_v34 = vpop.xlane.xlu0 %1071 }
 0x4dc   : > { %3193 = vrcp.f32 %v1072_v34  ;;  %v1340_v34 = vld [vmem:[#allocation18 + $0xa0] sm:$0xff] }
 0x4df   : > { %v1074_v35 = vpop.xlane.xlu0 %1073 }
 0x4e0   : > { %3195 = vrcp.f32 %v1074_v35  ;;  %v3682_v35 = vmov 0  }
 0x4e9   : > { %v3194_v36 = vpop.eup %3193 }
 0x4ea   : > { %v1077_v37 = vmul.f32 %v3194_v36, %v3190_v21  ;;  %v1353_v21 = vld [vmem:[#allocation18 + $0x108] sm:$0xff]  ;;  %v2715_v36 = vcombine.low %v1345_v29, %v1349_v32 }
 0x4eb   : > { %v2723_v25 = vcombine.low %v1353_v21, %v1357_v23  ;;  %v2724_v26 = vcombine.high %v1353_v21, %v1357_v23 }
 0x4ec   : > { %2288 = vst [vmem:[%s4201_s18] sm:$0xff] %v1077_v37 }
 0x4ed   : > { %v3196_v38 = vpop.eup %3195 }
 0x4ee   : > { %v1078_v39 = vmul.f32 %v3196_v38, %v3192_v22  ;;  %v2722_v22 = vcombine.high %v1352_v19, %v1356_v20  ;;  %v2706_v38 = vcombine.high %v1336_v33, %v1340_v34  ;;  %v1371_v19 = vld [vmem:[#allocation18 + $0x198] sm:$0xff] }
 0x4ef   : > { %v1375_v20 = vld [vmem:[#allocation18 + $0x1b8] sm:$0xff] }
 0x4f0   : > { %v1079_v40 = vpack.c.bf16 %v1078_v39, %v1077_v37  ;;  %2289 = vst [vmem:[%s4201_s18 + $0x8] sm:$0xff] %v1078_v39  ;;  %v2716_v37 = vcombine.high %v1345_v29, %v1349_v32  ;;  %v1337_v39 = vld [vmem:[#allocation18 + $0x88] sm:$0xff]  ;;  %v1367_v29 = vld [vmem:[#allocation18 + $0x178] sm:$0xff] }
 0x4f2   : > { %2940 = vmatmul.mubr.bf16.vlgmr.msra.gmra.mxu0 %v1079_v40  ;;  %v1341_v40 = vld [vmem:[#allocation18 + $0xa8] sm:$0xff] }
 0x4f3   : > { %1705 = vmatpush1.bf16.msra.mxu0 %v2745_v51  ;;  %1736 = vmatprep.mubr.bf16.mxu0 %v3682_v35  ;;  %v2708_v42 = vcombine.high %v1337_v39, %v1341_v40  ;;  %v1382_v51 = vld [vmem:[#allocation18 + $0x1f0] sm:$0xff] }
 0x4f4   : > { %1706 = vmatprep.subr.bf16.mxu0 %v2738_v58  ;;  %v2749_v54 = vcombine.low %v1378_v50, %v1382_v51  ;;  %v1325_v58 = vld [vmem:[#allocation18 + $0x28] sm:$0xff] }
 0x4f7   : > { %1707 = vmatpush1.bf16.msra.mxu0 %v2737_v61  ;;  %v2690_v61 = vcombine.high %v1320_v49, %v1324_v53  ;;  %v1343_v53 = vld [vmem:[#allocation18 + $0xb8] sm:$0xff] }
 0x4f8   : > { %1708 = vmatprep.subr.bf16.mxu0 %v2730_v15 }
 0x4fb   : > { %1709 = vmatpush1.bf16.msra.mxu0 %v2729_v17 }
 0x4fc   : > { %1710 = vmatprep.subr.bf16.mxu0 %v2722_v22 }
 0x4ff   : > { %1711 = vmatpush1.bf16.msra.mxu0 %v2721_v24 }
 0x500   : > { %1712 = vmatprep.subr.bf16.mxu0 %v2714_v31  ;;  %v2743_v31 = vcombine.low %v1371_v19, %v1375_v20 }
 0x503   : > { %1713 = vmatpush1.bf16.msra.mxu0 %v2713_v30 }
 0x504   : > { %1714 = vmatprep.subr.bf16.mxu0 %v2706_v38  ;;  %v1359_v38 = vld [vmem:[#allocation18 + $0x138] sm:$0xff] }
 0x5b2   : > { %v1178_v43 = vpop.f32.mrf.mxu0 }
 0x5b4   : > { %v2941_v44 = vpop.f32.mrf.mxu0 }
 0x5b5   : > { %v1329_v44 = vld [vmem:[#allocation18 + $0x48] sm:$0xff] }
 0x5b6   : > { %v1181_v45 = vpop.f32.mrf.mxu0 }
 0x5b7   : > { %v1185_v46 = vpack.c.bf16 %v1181_v45, %v1178_v43  ;;  %v1332_v43 = vld [vmem:[#allocation18 + $0x60] sm:$0xff]  ;;  %v1333_v45 = vld [vmem:[#allocation18 + $0x68] sm:$0xff] }
 0x5b8   : > { %v2942_v47 = vpop.f32.mrf.mxu0  ;;  %v2698_v48 = vcombine.high %v1328_v41, %v1332_v43  ;;  %v2700_v52 = vcombine.high %v1329_v44, %v1333_v45  ;;  %v2697_v59 = vcombine.low %v1328_v41, %v1332_v43  ;;  %v1346_v43 = vld [vmem:[#allocation18 + $0xd0] sm:$0xff] }
 0x5b9   : > { %2960 = vmatmul.mubr.bf16.vlgmr.msra.gmra.mxu1 %v1185_v46  ;;  %v2705_v46 = vcombine.low %v1336_v33, %v1340_v34  ;;  %v2707_v47 = vcombine.low %v1337_v39, %v1341_v40  ;;  %v2736_v33 = vcombine.high %v1363_v28, %v1367_v29  ;;  %v1354_v34 = vld [vmem:[#allocation18 + $0x110] sm:$0xff]  ;;  %v2735_v40 = vcombine.low %v1363_v28, %v1367_v29  ;;  %v3165_v28 = vld [vmem:[#allocation19 + $0x20] sm:$0xff]  }
 0x5ba   : > { %1748 = vmatpush1.bf16.msra.mxu1 %v2747_v56  ;;  %1779 = vmatprep.mubr.bf16.mxu1 %v3682_v35  ;;  %v1383_v56 = vld [vmem:[#allocation18 + $0x1f8] sm:$0xff]  ;;  %v3166_v29 = vld [vmem:[#allocation19 + $0xa0] sm:$0xff]  }
 0x5bb   : > { %1749 = vmatprep.subr.bf16.mxu1 %v2740_v60  ;;  %v2751_v3 = vcombine.low %v1379_v55, %v1383_v56  ;;  %1715 = vmatpush1.bf16.msra.mxu0 %v2705_v46  ;;  %v2699_v60 = vcombine.low %v1329_v44, %v1333_v45  ;;  %v1350_v44 = vld [vmem:[#allocation18 + $0xf0] sm:$0xff]  ;;  %v1347_v45 = vld [vmem:[#allocation18 + $0xd8] sm:$0xff] }
 0x5bc   : > { %1716 = vmatprep.subr.bf16.mxu0 %v2698_v48  ;;  %v1351_v46 = vld [vmem:[#allocation18 + $0xf8] sm:$0xff]  ;;  %v2718_v49 = vcombine.high %v1346_v43, %v1350_v44 }
 0x5be   : > { %1750 = vmatpush1.bf16.msra.mxu1 %v2739_v62  ;;  %v2692_v62 = vcombine.high %v1321_v57, %v1325_v58 }
 0x5bf   : > { %1751 = vmatprep.subr.bf16.mxu1 %v2732_v18  ;;  %1717 = vmatpush1.bf16.msra.mxu0 %v2697_v59  ;;  %v1374_v18 = vld [vmem:[#allocation18 + $0x1b0] sm:$0xff]  ;;  %v1331_v59 = vld [vmem:[#allocation18 + $0x58] sm:$0xff] }
 0x5c0   : > { %1718 = vmatprep.subr.bf16.mxu0 %v2690_v61 }
 0x5c2   : > { %1752 = vmatpush1.bf16.msra.mxu1 %v2731_v1  ;;  %v1370_v1 = vld [vmem:[#allocation18 + $0x190] sm:$0xff] }
 0x5c3   : > { %1753 = vmatprep.subr.bf16.mxu1 %v2724_v26  ;;  %1719 = vmatpush1.bf16.msra.mxu0 %v2689_v63  ;;  %v2742_v24 = vcombine.high %v1370_v1, %v1374_v18  ;;  %v1362_v26 = vld [vmem:[#allocation18 + $0x150] sm:$0xff]  ;;  %v2741_v30 = vcombine.low %v1370_v1, %v1374_v18  ;;  %v3154_v1 = vld [vmem:[#allocation19 + $0xb8] sm:$0xff]  }
 0x5c4   : > { %v2734_v32 = vcombine.high %v1362_v26, %v1366_v27  ;;  %v2733_v39 = vcombine.low %v1362_v26, %v1366_v27  ;;  %v3155_v18 = vld [vmem:[#allocation19 + $0x70] sm:$0xff]   ;;  %v3163_v26 = vld [vmem:[#allocation19 + $0x60] sm:$0xff]  }
 0x5c5   : > { %v3164_v27 = vld [vmem:[#allocation19 + $0xe0] sm:$0xff]  }
 0x5c6   : > { %1754 = vmatpush1.bf16.msra.mxu1 %v2723_v25  ;;  %v2744_v25 = vcombine.high %v1371_v19, %v1375_v20  ;;  %v3156_v19 = vld [vmem:[#allocation19 + $0xf0] sm:$0xff]  }
 0x5c7   : > { %1755 = vmatprep.subr.bf16.mxu1 %v2716_v37  ;;  %v1355_v37 = vld [vmem:[#allocation18 + $0x118] sm:$0xff]  ;;  %v3157_v20 = vld [vmem:[#allocation19 + $0x30] sm:$0xff]  }
 0x5c8   : > { %v2727_v48 = vcombine.low %v1355_v37, %v1359_v38 }
 0x5ca   : > { %1756 = vmatpush1.bf16.msra.mxu1 %v2715_v36  ;;  %v1358_v36 = vld [vmem:[#allocation18 + $0x130] sm:$0xff] }
 0x5cb   : > { %1757 = vmatprep.subr.bf16.mxu1 %v2708_v42  ;;  %v2726_v41 = vcombine.high %v1354_v34, %v1358_v36  ;;  %v2728_v42 = vcombine.high %v1355_v37, %v1359_v38  ;;  %v3173_v37 = vld [vmem:[#allocation19 + $0x10] sm:$0xff]  }
 0x5cc   : > { %v3174_v38 = vld [vmem:[#allocation19 + $0x90] sm:$0xff]  }
 0x5ce   : > { %1758 = vmatpush1.bf16.msra.mxu1 %v2707_v47  ;;  %v2725_v47 = vcombine.low %v1354_v34, %v1358_v36  ;;  %v3171_v34 = vld [vmem:[#allocation19 + $0x50] sm:$0xff]  }
 0x5cf   : > { %1759 = vmatprep.subr.bf16.mxu1 %v2700_v52  ;;  %v1339_v52 = vld [vmem:[#allocation18 + $0x98] sm:$0xff]  ;;  %v3172_v36 = vld [vmem:[#allocation19 + $0xd0] sm:$0xff]  }
 0x5d2   : > { %1760 = vmatpush1.bf16.msra.mxu1 %v2699_v60  ;;  %v1335_v60 = vld [vmem:[#allocation18 + $0x78] sm:$0xff] }
 0x5d3   : > { %1761 = vmatprep.subr.bf16.mxu1 %v2692_v62  ;;  %v2711_v62 = vcombine.low %v1339_v52, %v1343_v53 }
 0x679   : > { %v1284_v4 = vpop.f32.mrf.mxu1 }
 0x67a   : > { %v4207_v5 = vadd.f32 %v1292_v2, %v1284_v4  ;;  %v2691_v2 = vcombine.low %v1321_v57, %v1325_v58  ;;  %v2750_v4 = vcombine.high %v1378_v50, %v1382_v51  ;;  %v1338_v50 = vld [vmem:[#allocation18 + $0x90] sm:$0xff]  ;;  %v2712_v57 = vcombine.high %v1339_v52, %v1343_v53 }
 0x67b   : > { %v2961_v7 = vpop.f32.mrf.mxu1  ;;  %v1342_v51 = vld [vmem:[#allocation18 + $0xb0] sm:$0xff] }
 0x67c   : > { %v1297_v8 = vmul.f32 %v4207_v5, %v4207_v5  ;;  %1762 = vmatpush1.bf16.msra.mxu1 %v2691_v2  ;;  %1790 = vmatprep.subr.bf16.mxu0 %v2750_v4  ;;  %v1330_v58 = vld [vmem:[#allocation18 + $0x50] sm:$0xff]  ;;  %v2709_v61 = vcombine.low %v1338_v50, %v1342_v51  ;;  %v2704_v2 = vcombine.high %v1331_v59, %v1335_v60 }
 0x67d   : > { %v1287_v9 = vpop.f32.mrf.mxu1  ;;  %v1322_v4 = vld [vmem:[#allocation18 + $0x10] sm:$0xff] }
 0x67e   : > { %v4212_v10 = vadd.f32 %v1293_v6, %v1287_v9  ;;  %1299 = vadd.xlane.f32.xlu0 %v1297_v8  ;;  %v2752_v6 = vcombine.high %v1379_v55, %v1383_v56  ;;  %v2719_v55 = vcombine.low %v1347_v45, %v1351_v46  ;;  %v2710_v56 = vcombine.high %v1338_v50, %v1342_v51 }
 0x67f   : > { %v2962_v11 = vpop.f32.mrf.mxu1 }
 0x680   : > { %v1298_v12 = vmul.f32 %v4212_v10, %v4212_v10  ;;  %1833 = vmatprep.subr.bf16.mxu1 %v2752_v6  ;;  %v1326_v6 = vld [vmem:[#allocation18 + $0x30] sm:$0xff] }
 0x682   : > { %1301 = vadd.xlane.f32.xlu0 %v1298_v12 }
 0x707   : > { %v1300_v7 = vpop.xlane.xlu0 %1299 }
 0x708   : > { %v1303_v8 = vmul.f32 0.0078125, %v1300_v7  ;;  %v1323_v7 = vld [vmem:[#allocation18 + $0x18] sm:$0xff] }
 0x70a   : > { %v1305_v9 = vadd.f32 1e-06, %v1303_v8  ;;  %v1327_v8 = vld [vmem:[#allocation18 + $0x38] sm:$0xff] }
 0x70b   : > { %v1302_v11 = vpop.xlane.xlu0 %1301 }
 0x70c   : > { %3197 = vrsqrt.f32 %v1305_v9  ;;  %v1304_v12 = vmul.f32 0.0078125, %v1302_v11  ;;  %v2703_v11 = vcombine.low %v1331_v59, %v1335_v60 }
 0x70e   : > { %v1306_v13 = vadd.f32 1e-06, %v1304_v12  ;;  %v2694_v12 = vcombine.high %v1322_v4, %v1326_v6 }
 0x710   : > { %3199 = vrsqrt.f32 %v1306_v13  ;;  %v2696_v13 = vcombine.high %v1323_v7, %v1327_v8 }
 0x719   : > { %v3198_v0 = vpop.eup %3197 }
 0x71a   : > { %v1309_v14 = vmul.f32 %v3198_v0, %v4207_v5  ;;  %v2693_v0 = vcombine.low %v1322_v4, %v1326_v6 }
 0x71c   : > { %v1317_v21 = vmul.f32 %v2688_v16, %v1309_v14  ;;  %v2695_v14 = vcombine.low %v1323_v7, %v1327_v8 }
 0x71d   : > { %v3200_v15 = vpop.eup %3199 }
 0x71e   : > { %v1310_v17 = vmul.f32 %v3200_v15, %v4212_v10  ;;  %v3151_v15 = vld [vmem:[#allocation19 + $0x78] sm:$0xff]  }
 0x720   : > { %v1318_v22 = vmul.f32 %v2688_v16, %v1310_v17  ;;  %v3152_v16 = vld [vmem:[#allocation19 + $0xf8] sm:$0xff]  }
 0x721   : > { %v3153_v17 = vld [vmem:[#allocation19 + $0x38] sm:$0xff]  }
 0x722   : > { %v4223_v23 = vpack.c.bf16 %v1318_v22, %v1317_v21  ;;  %v3158_v21 = vld [vmem:[#allocation19 + $0xb0] sm:$0xff]   ;;  %v3159_v22 = vld [vmem:[#allocation19 + $0x68] sm:$0xff]  }
 0x724   : > { %1737 = vmatmul.mubr.bf16.vlgmr.msra.gmra.mxu0 %v4223_v23  ;;  %1780 = vmatmul.mubr.bf16.vlgmr.msra.gmra.mxu1 %v4223_v23 }
 0x725   : > { %1791 = vmatpush1.bf16.msra.mxu0 %v2749_v54  ;;  %1834 = vmatpush1.bf16.msra.mxu1 %v2751_v3  ;;  %v2717_v54 = vcombine.low %v1346_v43, %v1350_v44  ;;  %v1334_v3 = vld [vmem:[#allocation18 + $0x70] sm:$0xff]  ;;  %v3179_v43 = vld [vmem:[#allocation19 + $0x40] sm:$0xff]  }
 0x726   : > { %1792 = vmatprep.subr.bf16.mxu0 %v2742_v24  ;;  %1835 = vmatprep.subr.bf16.mxu1 %v2744_v25  ;;  %v2702_v63 = vcombine.high %v1330_v58, %v1334_v3  ;;  %v2701_v9 = vcombine.low %v1330_v58, %v1334_v3  ;;  %v3160_v24 = vld [vmem:[#allocation19 + $0xe8] sm:$0xff]   ;;  %v3180_v44 = vld [vmem:[#allocation19 + $0xc0] sm:$0xff]  }
 0x727   : > { %1822 = vmatprep.mubr.bf16.mxu0 %v3682_v35  ;;  %1865 = vmatprep.mubr.bf16.mxu1 %v3682_v35  ;;  %v2720_v35 = vcombine.high %v1347_v45, %v1351_v46  ;;  %v3161_v25 = vld [vmem:[#allocation19 + $0x28] sm:$0xff]   ;;  %v3181_v45 = vld [vmem:[#allocation19] sm:$0xff]  }
 0x728   : > { %v3182_v46 = vld [vmem:[#allocation19 + $0x80] sm:$0xff]  }
 0x729   : > { %1793 = vmatpush1.bf16.msra.mxu0 %v2741_v30  ;;  %1836 = vmatpush1.bf16.msra.mxu1 %v2743_v31  ;;  %v3167_v30 = vld [vmem:[#allocation19 + $0x58] sm:$0xff]  }
 0x72a   : > { %1794 = vmatprep.subr.bf16.mxu0 %v2734_v32  ;;  %1837 = vmatprep.subr.bf16.mxu1 %v2736_v33  ;;  %v3168_v31 = vld [vmem:[#allocation19 + $0xd8] sm:$0xff]  }
 0x72b   : > { %v3169_v32 = vld [vmem:[#allocation19 + $0x18] sm:$0xff]  }
 0x72c   : > { %v3170_v33 = vld [vmem:[#allocation19 + $0x98] sm:$0xff]  }
 0x72d   : > { %1795 = vmatpush1.bf16.msra.mxu0 %v2733_v39  ;;  %1838 = vmatpush1.bf16.msra.mxu1 %v2735_v40  ;;  %v3175_v39 = vld [vmem:[#allocation19 + $0x48] sm:$0xff]  }
 0x72e   : > { %1796 = vmatprep.subr.bf16.mxu0 %v2726_v41  ;;  %1839 = vmatprep.subr.bf16.mxu1 %v2728_v42  ;;  %v3176_v40 = vld [vmem:[#allocation19 + $0xc8] sm:$0xff]  }
 0x72f   : > { %v3177_v41 = vld [vmem:[#allocation19 + $0x8] sm:$0xff]  }
 0x730   : > { %v3178_v42 = vld [vmem:[#allocation19 + $0x88] sm:$0xff]  }
 0x731   : > { %1797 = vmatpush1.bf16.msra.mxu0 %v2725_v47  ;;  %1840 = vmatpush1.bf16.msra.mxu1 %v2727_v48 }
 0x732   : > { %1798 = vmatprep.subr.bf16.mxu0 %v2718_v49  ;;  %1841 = vmatprep.subr.bf16.mxu1 %v2720_v35 }
 0x735   : > { %1799 = vmatpush1.bf16.msra.mxu0 %v2717_v54  ;;  %1842 = vmatpush1.bf16.msra.mxu1 %v2719_v55 }
 0x736   : > { %1800 = vmatprep.subr.bf16.mxu0 %v2710_v56  ;;  %1843 = vmatprep.subr.bf16.mxu1 %v2712_v57 }
 0x739   : > { %1801 = vmatpush1.bf16.msra.mxu0 %v2709_v61  ;;  %1844 = vmatpush1.bf16.msra.mxu1 %v2711_v62 }
 0x73a   : > { %1802 = vmatprep.subr.bf16.mxu0 %v2702_v63  ;;  %1845 = vmatprep.subr.bf16.mxu1 %v2704_v2 }
 0x73d   : > { %1803 = vmatpush1.bf16.msra.mxu0 %v2701_v9  ;;  %1846 = vmatpush1.bf16.msra.mxu1 %v2703_v11 }
 0x73e   : > { %1804 = vmatprep.subr.bf16.mxu0 %v2694_v12  ;;  %1847 = vmatprep.subr.bf16.mxu1 %v2696_v13 }
 0x741   : > { %1805 = vmatpush1.bf16.msra.mxu0 %v2693_v0  ;;  %1848 = vmatpush1.bf16.msra.mxu1 %v2695_v14 }
 0x742   : > { %2839 = vmatprep.subr.bf16.mxu0 %v3151_v15  ;;  %2861 = vmatprep.subr.bf16.mxu1 %v3152_v16 }
 0x744   : > { %1823 = vmatmul.mubr.bf16.vlgmr.msra.gmra.mxu0 %v4223_v23  ;;  %1866 = vmatmul.mubr.bf16.vlgmr.msra.gmra.mxu1 %v4223_v23  ;;  %v3162_v23 = vld [vmem:[#allocation19 + $0xa8] sm:$0xff]  }
 0x745   : > { %2840 = vmatpush3.bf16.msra.mxu0 %v3153_v17  ;;  %2862 = vmatpush3.bf16.msra.mxu1 %v3154_v1 }
 0x746   : > { %2841 = vmatprep.subr.bf16.mxu0 %v3155_v18  ;;  %2863 = vmatprep.subr.bf16.mxu1 %v3156_v19 }
 0x749   : > { %2842 = vmatpush3.bf16.msra.mxu0 %v3157_v20  ;;  %2864 = vmatpush3.bf16.msra.mxu1 %v3158_v21 }
 0x74a   : > { %2843 = vmatprep.subr.bf16.mxu0 %v3159_v22  ;;  %2865 = vmatprep.subr.bf16.mxu1 %v3160_v24 }
 0x74d   : > { %2844 = vmatpush3.bf16.msra.mxu0 %v3161_v25  ;;  %2866 = vmatpush3.bf16.msra.mxu1 %v3162_v23 }
 0x74e   : > { %2845 = vmatprep.subr.bf16.mxu0 %v3163_v26  ;;  %2867 = vmatprep.subr.bf16.mxu1 %v3164_v27 }
 0x751   : > { %2846 = vmatpush3.bf16.msra.mxu0 %v3165_v28  ;;  %2868 = vmatpush3.bf16.msra.mxu1 %v3166_v29 }
 0x752   : > { %2847 = vmatprep.subr.bf16.mxu0 %v3167_v30  ;;  %2869 = vmatprep.subr.bf16.mxu1 %v3168_v31 }
 0x755   : > { %2848 = vmatpush3.bf16.msra.mxu0 %v3169_v32  ;;  %2870 = vmatpush3.bf16.msra.mxu1 %v3170_v33 }
 0x756   : > { %2849 = vmatprep.subr.bf16.mxu0 %v3171_v34  ;;  %2871 = vmatprep.subr.bf16.mxu1 %v3172_v36 }
 0x759   : > { %2850 = vmatpush3.bf16.msra.mxu0 %v3173_v37  ;;  %2872 = vmatpush3.bf16.msra.mxu1 %v3174_v38 }
 0x75a   : > { %2851 = vmatprep.subr.bf16.mxu0 %v3175_v39  ;;  %2873 = vmatprep.subr.bf16.mxu1 %v3176_v40 }
 0x75d   : > { %2852 = vmatpush3.bf16.msra.mxu0 %v3177_v41  ;;  %2874 = vmatpush3.bf16.msra.mxu1 %v3178_v42 }
 0x75e   : > { %2853 = vmatprep.subr.bf16.mxu0 %v3179_v43  ;;  %2875 = vmatprep.subr.bf16.mxu1 %v3180_v44 }
 0x761   : > { %2854 = vmatpush3.bf16.msra.mxu0 %v3181_v45  ;;  %2876 = vmatpush3.bf16.msra.mxu1 %v3182_v46 }
 0x7e4   : > { %v4231_v47 = vpop.f32.mrf.mxu0  ;;  %v4233_v48 = vpop.f32.mrf.mxu1 }
 0x7e5   : > { %v1876_v49 = vsub.f32 0.0, %v4231_v47  ;;  %v1878_v35 = vsub.f32 0.0, %v4233_v48 }
 0x7e6   : > { %v4237_v50 = vpop.f32.mrf.mxu0  ;;  %v4239_v51 = vpop.f32.mrf.mxu1 }
 0x7e7   : > { %v1884_v52 = vmul.f32 1.442695, %v1876_v49  ;;  %v1888_v53 = vmul.f32 1.442695, %v1878_v35  ;;  %v1877_v54 = vsub.f32 0.0, %v4237_v50  ;;  %v1879_v55 = vsub.f32 0.0, %v4239_v51 }
 0x7e8   : > { %v1742_v56 = vpop.f32.mrf.mxu0  ;;  %v1785_v57 = vpop.f32.mrf.mxu1 }
 0x7e9   : > { %3201 = vpow2.f32 %v1884_v52  ;;  %v1886_v58 = vmul.f32 1.442695, %v1877_v54  ;;  %v1890_v3 = vmul.f32 1.442695, %v1879_v55  ;;  %v1880_v59 = vsub.f32 0.0, %v1742_v56 }
 0x7ea   : > { %3203 = vpow2.f32 %v1888_v53  ;;  %v1882_v60 = vsub.f32 0.0, %v1785_v57  ;;  %v1744_v61 = vpop.f32.mrf.mxu0  ;;  %v1787_v62 = vpop.f32.mrf.mxu1 }
 0x7eb   : > { %3205 = vpow2.f32 %v1886_v58  ;;  %v1892_v63 = vmul.f32 1.442695, %v1880_v59  ;;  %v1881_v2 = vsub.f32 0.0, %v1744_v61  ;;  %v1883_v4 = vsub.f32 0.0, %v1787_v62 }
 0x7ec   : > { %3207 = vpow2.f32 %v1890_v3  ;;  %v1896_v6 = vmul.f32 1.442695, %v1882_v60 }
 0x7ed   : > { %3209 = vpow2.f32 %v1892_v63  ;;  %v1894_v7 = vmul.f32 1.442695, %v1881_v2  ;;  %v1898_v8 = vmul.f32 1.442695, %v1883_v4 }
 0x7ee   : > { %3211 = vpow2.f32 %v1896_v6 }
 0x7ef   : > { %3213 = vpow2.f32 %v1894_v7 }
 0x7f0   : > { %3215 = vpow2.f32 %v1898_v8 }
 0x7f6   : > { %v3202_v9 = vpop.eup %3201 }
 0x7f7   : > { %v3204_v11 = vpop.eup %3203  ;;  %v1900_v12 = vadd.f32 1.0, %v3202_v9 }
 0x7f8   : > { %v3206_v13 = vpop.eup %3205  ;;  %v1902_v0 = vadd.f32 1.0, %v3204_v11 }
 0x7f9   : > { %v3208_v14 = vpop.eup %3207  ;;  %3217 = vrcp.f32 %v1900_v12  ;;  %v1901_v15 = vadd.f32 1.0, %v3206_v13 }
 0x7fa   : > { %v3210_v16 = vpop.eup %3209  ;;  %3219 = vrcp.f32 %v1902_v0  ;;  %v1903_v17 = vadd.f32 1.0, %v3208_v14 }
 0x7fb   : > { %v3212_v1 = vpop.eup %3211  ;;  %3221 = vrcp.f32 %v1901_v15  ;;  %v1904_v18 = vadd.f32 1.0, %v3210_v16 }
 0x7fc   : > { %v3214_v19 = vpop.eup %3213  ;;  %3223 = vrcp.f32 %v1903_v17  ;;  %v1906_v20 = vadd.f32 1.0, %v3212_v1 }
 0x7fd   : > { %v3216_v21 = vpop.eup %3215  ;;  %3225 = vrcp.f32 %v1904_v18  ;;  %v1905_v22 = vadd.f32 1.0, %v3214_v19 }
 0x7fe   : > { %3227 = vrcp.f32 %v1906_v20  ;;  %v1907_v24 = vadd.f32 1.0, %v3216_v21 }
 0x7ff   : > { %3229 = vrcp.f32 %v1905_v22 }
 0x800   : > { %3231 = vrcp.f32 %v1907_v24 }
 0x804   : > { %v1824_v25 = vpop.f32.mrf.mxu0  ;;  %v1867_v23 = vpop.f32.mrf.mxu1 }
 0x806   : > { %v3218_v26 = vpop.eup %3217  ;;  %v1826_v27 = vpop.f32.mrf.mxu0 }
 0x807   : > { %v3220_v28 = vpop.eup %3219  ;;  %v1869_v29 = vpop.f32.mrf.mxu1  ;;  %v1924_v40 = vmul.f32 %v3218_v26, %v4231_v47 }
 0x808   : > { %v3222_v30 = vpop.eup %3221  ;;  %v1828_v33 = vpop.f32.mrf.mxu0  ;;  %v1926_v44 = vmul.f32 %v3220_v28, %v4233_v48 }
 0x809   : > { %v3224_v31 = vpop.eup %3223  ;;  %v1925_v36 = vmul.f32 %v3222_v30, %v4237_v50  ;;  %v1871_v38 = vpop.f32.mrf.mxu1  ;;  %v1932_v55 = vmul.f32 %v1924_v40, %v1824_v25 }
 0x80a   : > { %v3226_v32 = vpop.eup %3225  ;;  %v1927_v41 = vmul.f32 %v3224_v31, %v4239_v51  ;;  %v1830_v35 = vpop.f32.mrf.mxu0  ;;  %v1934_v58 = vmul.f32 %v1926_v44, %v1867_v23 }
 0x80b   : > { %v3228_v34 = vpop.eup %3227  ;;  %v1928_v37 = vmul.f32 %v3226_v32, %v1742_v56  ;;  %v1933_v52 = vmul.f32 %v1925_v36, %v1826_v27  ;;  %v1873_v50 = vpop.f32.mrf.mxu1 }
 0x80c   : > { %v3230_v39 = vpop.eup %3229  ;;  %v1930_v42 = vmul.f32 %v3228_v34, %v1785_v57  ;;  %v1935_v56 = vmul.f32 %v1927_v41, %v1869_v29 }
 0x80d   : > { %v3232_v43 = vpop.eup %3231  ;;  %v1929_v45 = vmul.f32 %v3230_v39, %v1744_v61  ;;  %v1936_v49 = vmul.f32 %v1928_v37, %v1828_v33 }
 0x80e   : > { %v1931_v46 = vmul.f32 %v3232_v43, %v1787_v62  ;;  %v1938_v53 = vmul.f32 %v1930_v42, %v1871_v38 }
 0x80f   : > { %v1937_v54 = vmul.f32 %v1929_v45, %v1830_v35  ;;  %v1940_v57 = vpack.c.bf16 %v1936_v49, %v1932_v55 }
 0x810   : > { %v1939_v47 = vmul.f32 %v1931_v46, %v1873_v50  ;;  %v1942_v48 = vpack.c.bf16 %v1938_v53, %v1934_v58 }
 0x811   : > { %v1941_v51 = vpack.c.bf16 %v1937_v54, %v1933_v52 }
 0x812   : > { %v1943_v3 = vpack.c.bf16 %v1939_v47, %v1935_v56 }
 0x813   : > { %2232 = vmatprep.mubr.bf16.mxu0 %v1941_v51 }
 0x814   : > { %2273 = vmatprep.mubr.bf16.mxu1 %v1943_v3  ;;  %2233 = vmatmul.mubr.bf16.vlgmr.msra.gmra.mxu0 %v1940_v57 }
 0x815   : > { %2274 = vmatmul.mubr.bf16.vlgmr.msra.gmra.mxu1 %v1942_v48 }
 0x816   : > { %3525 = shalt.err (!%p3522_p4)
}
 0x817   : > { %s3526_s27 = scalar_lea.hbm %s4257_s29, 256  ;;  %s3530_s21 = scalar_lea.hbm %s4464_s2, 512 }
 0x818   : > { %p3527_p13 = scmp.ne.s32.totalorder %s4257_s29, %s3526_s27  ;;  %p3531_p7 = scmp.lt.s32.totalorder %s4257_s29, %s4464_s2 }
 0x819   : > { %p3532_p8 = scmp.lt.s32.totalorder %s3530_s21, %s3526_s27 }
 0x81a   : > { %p3528_p3 = pnand %p3527_p13, %p4465_p0 }
 0x81b   : > { %p3533_p1 = por %p3532_p8, %p3531_p7 }
 0x81c   : > { %p3529_p6 = pneg %p3528_p3 }
 0x81e   : > { %p3534_p9 = pnand %p3533_p1, %p3529_p6 }
 0x820   : > { %3537 = shalt.err (!%p3534_p9)
}
 0x821   : > { %s3684_s25 = smov 128   ;;  %s3685_s16 = smov 8  }
 0x822   : > { %3002 = dma.vmem_to_hbm [thread:$0]  (%p4465_p0), %s4248_s30, 256, %s4257_s29, %s2296_s11, %s3684_s25, %s3684_s25, %s3685_s16  }
 0x823   : > { %s4466_s20 = sld [smem:[#allocation51_spill]]  ;;  %s2346_s27 = sshll.u32 %s4201_s18, 4  ;;  %s2347_s27 = int_to_ptr.vmem [resolvable:$true] %s2346_s27 }
 0x824   : > { %s3538_s15 = scalar_lea.vmem %s2347_s27, 256  ;;  %s3686_s9 = smov [#allocation24]  }
 0x825   : > { %p3539_p11 = scmp.ne.s32.totalorder %s2347_s27, %s3538_s15  ;;  %s3542_s21 = sshll.u32 %s3686_s9, 4  ;;  %s3543_s21 = int_to_ptr.vmem [resolvable:$false] %s3542_s21 }
 0x826   : > { %s3544_s19 = scalar_lea.vmem %s3543_s21, 512  ;;  %p3545_p12 = scmp.lt.s32.totalorder %s2347_s27, %s3543_s21 }
 0x827   : > { %p3540_p2 = pnand %p3539_p11, %p4465_p0  ;;  %p3546_p10 = scmp.lt.s32.totalorder %s3544_s19, %s3538_s15 }
 0x829   : > { %s4289_s5 = scalar_lea.hbm %s4466_s20, %s4251_s0  ;;  %p3541_p5 = pneg %p3540_p2 }
 0x82a   : > { %p3547_p4 = por %p3546_p10, %p3545_p12 }
 0x82c   : > { %p3548_p13 = pnand %p3547_p4, %p3541_p5 }
 0x82e   : > { %3551 = shalt.err (!%p3548_p13)
}
 0x82f   : > { %s3552_s18 = scalar_lea.hbm %s4289_s5, 256  ;;  %s3556_s7 = scalar_lea.hbm %s4466_s20, 512 }
 0x830   : > { %p3553_p3 = scmp.ne.s32.totalorder %s4289_s5, %s3552_s18  ;;  %p3557_p8 = scmp.lt.s32.totalorder %s4289_s5, %s4466_s20 }
 0x831   : > { %p3558_p1 = scmp.lt.s32.totalorder %s3556_s7, %s3552_s18 }
 0x832   : > { %p3554_p6 = pnand %p3553_p3, %p4465_p0 }
 0x833   : > { %p3559_p9 = por %p3558_p1, %p3557_p8 }
 0x834   : > { %p3555_p7 = pneg %p3554_p6 }
 0x836   : > { %p3560_p11 = pnand %p3559_p9, %p3555_p7 }
 0x838   : > { %3563 = shalt.err (!%p3560_p11)
}
 0x839   : > { %3003 = dma.vmem_to_hbm [thread:$0]  (%p4465_p0), %s2347_s27, 256, %s4289_s5, %s2296_s11, %s3684_s25, %s3684_s25, %s3685_s16  }
 0x83a   : > { %s759_s28 = scalar_lea.vmem [#allocation21], %s4088_s6  ;;  %s4467_s27 = sld [smem:[#allocation49_spill]] }
 0x83b   : > { %s2314_s15 = sshll.u32 %s759_s28, 4  ;;  %s2291_s21 = scalar_lea.sflag [#allocation4], %s4085_s8  ;;  %s4315_s15 = int_to_ptr.vmem [resolvable:$true] %s2314_s15 }
 0x83c   : > { %s3564_s19 = scalar_lea.vmem %s4315_s15, 256  ;;  %s3687_s6 = smov [#allocation21]  }
 0x83d   : > { %p3565_p2 = scmp.ne.s32.totalorder %s4315_s15, %s3564_s19  ;;  %s3568_s18 = sshll.u32 %s3687_s6, 4  ;;  %s3569_s18 = int_to_ptr.vmem [resolvable:$false] %s3568_s18 }
 0x83e   : > { %s3570_s30 = scalar_lea.vmem %s3569_s18, 512  ;;  %p3571_p10 = scmp.lt.s32.totalorder %s4315_s15, %s3569_s18 }
 0x83f   : > { %p3566_p5 = pnand %p3565_p2, %p4465_p0  ;;  %p3572_p4 = scmp.lt.s32.totalorder %s3570_s30, %s3564_s19 }
 0x840   : > { %s4322_s9 = scalar_lea.hbm %s4467_s27, %s4251_s0 }
 0x841   : > { %p3567_p12 = pneg %p3566_p5  ;;  %p3573_p13 = por %p3572_p4, %p3571_p10 }
 0x843   : > { %p3574_p3 = pnand %p3573_p13, %p3567_p12 }
 0x8d4   : > { %v2855_v59 = vpop.f32.mrf.mxu0 }
 0x8d5   : > { %v2877_v60 = vpop.f32.mrf.mxu1 }
 0x8d6   : > { %v2856_v61 = vpop.f32.mrf.mxu0 }
 0x8d7   : > { %v2857_v62 = vadd.f32 %v2856_v61, %v2855_v59  ;;  %v2878_v63 = vpop.f32.mrf.mxu1 }
 0x8d8   : > { %v2879_v2 = vadd.f32 %v2878_v63, %v2877_v60  ;;  %v2858_v4 = vpop.f32.mrf.mxu0 }
 0x8d9   : > { %v2880_v6 = vpop.f32.mrf.mxu1 }
 0x8da   : > { %v2276_v7 = vadd.f32 %v2879_v2, %v2857_v62  ;;  %v2859_v8 = vpop.f32.mrf.mxu0 }
 0x8db   : > { %v2860_v9 = vadd.f32 %v2859_v8, %v2858_v4  ;;  %v2881_v11 = vpop.f32.mrf.mxu1 }
 0x8dc   : > { %v2282_v12 = vadd.f32 %v2276_v7, %v4207_v5  ;;  %v2882_v13 = vadd.f32 %v2881_v11, %v2880_v6 }
 0x8de   : > { %2284 = vst [vmem:[%s759_s28] sm:$0xff] %v2282_v12  ;;  %v2279_v0 = vadd.f32 %v2882_v13, %v2860_v9 }
 0x8e0   : > { %v2283_v14 = vadd.f32 %v2279_v0, %v4212_v10 }
 0x8e2   : > { %2285 = vst [vmem:[%s759_s28 + $0x8] sm:$0xff] %v2283_v14 }
 0x8e3   : > { %3577 = shalt.err (!%p3574_p3)
}
 0x8e4   : > { %s3578_s0 = scalar_lea.hbm %s4322_s9, 256  ;;  %s3582_s7 = scalar_lea.hbm %s4467_s27, 512 }
 0x8e5   : > { %p3579_p6 = scmp.ne.s32.totalorder %s4322_s9, %s3578_s0  ;;  %p3583_p1 = scmp.lt.s32.totalorder %s4322_s9, %s4467_s27 }
 0x8e6   : > { %p3584_p9 = scmp.lt.s32.totalorder %s3582_s7, %s3578_s0 }
 0x8e7   : > { %p3580_p7 = pnand %p3579_p6, %p4465_p0 }
 0x8e8   : > { %p3585_p11 = por %p3584_p9, %p3583_p1 }
 0x8e9   : > { %p3581_p8 = pneg %p3580_p7 }
 0x8eb   : > { %p3586_p2 = pnand %p3585_p11, %p3581_p8 }
 0x8ed   : > { %3589 = shalt.err (!%p3586_p2)
}
 0x8ee   : > { %3001 = dma.vmem_to_hbm [thread:$0]  (%p4465_p0), %s4315_s15, 256, %s4322_s9, %s2291_s21, %s3684_s25, %s3684_s25, %s3685_s16  }
 0x8ef PF: > { %s4468_s28 = sld [smem:[#allocation35_spill]]  ;;  %p4471_p12 = scmp.ge.s32.totalorder %s3660_s24, 2 }
 0x8f0   : > { %s4469_s11 = sld [smem:[#allocation40_spill]] }
 0x8f5   : > { %s2361_s5 = sand.u32 1, %s4468_s28  }
 0x8f6   : > { %p4470_p5 = scmp.ne.s32.totalorder %s4469_s11, 0  ;;  %s2362_s19 = scalar_lea.sflag [#allocation4], %s2361_s5 }
 0x8f8   : > { %p3043_p10 = pnand %p4471_p12, %p4470_p5 }
 0x8fa   : > { %p3044_p4 = pneg %p3043_p10 }
 0x8fc   : > { %3639 = dma.done.wait (%p3044_p4), %s2362_s19, 256  }
 0x8fd   : > { %3641 = vsyncadd (%p3044_p4), %s2362_s19, 4294967040  ;;  %s4472_s26 = sadd.s32 4294967294, %s3660_s24  }
 0x8fe   : > { %s2370_s6 = sand.u32 1, %s4472_s26  }
 0x8ff   : > { %s2371_s18 = scalar_lea.sflag [#allocation23], %s2370_s6 }
 0x900   : > { %3643 = dma.done.wait (%p3044_p4), %s2371_s18, 512  }
 0x901   : > { %3645 = vsyncadd (%p3044_p4), %s2371_s18, 4294966784  ;;  %s4473_s24 = sld [smem:[#allocation36_spill]]  ;;  %s4475_s21 = smov %s3652_s22 }
 0x902   : > { %s4474_s25 = sld [smem:[#allocation37_spill]]  ;;  %s4476_s22 = smov %s3656_s23 }
 0x907   : > { %p43_p0 = scmp.ge.s32.totalorder %s4473_s24, 4  }
 0x908   : > { %s4477_s23 = smov %s4474_s25 }
 0x909   :  { %45 = sbr.rel (!%p43_p0) target bundleno = 27 (0x1b), region = 219 }
 0x90e   :  { %2385 = vsyncpa [#allocation3], 1 }
 0x90f   :  { %2387 = vsyncpa [#allocation3 + $0x1], 1 }
 0x910   :  { %2388 = vsyncpa [#allocation8], 1 }
 0x911   :  { %2390 = vsyncpa [#allocation8 + $0x1], 1 }
 0x912   :  { %2391 = vsyncpa [#allocation11], 1 }
 0x913   :  { %2393 = vsyncpa [#allocation11 + $0x1], 1 }
 0x914   :  { %2394 = vsyncpa [#allocation14], 1 }
 0x915   :  { %2395 = vsyncpa [#allocation17], 1 }
 0x916   :  { %2396 = vsyncpa [#allocation20], 1 }
 0x917   :  { %2397 = vsyncpa [#allocation4], 1 }
 0x918   :  { %2399 = vsyncpa [#allocation4 + $0x1], 1 }
 0x919   :  { %2400 = vsyncpa [#allocation23], 1 }
 0x91a   :  { %2402 = vsyncpa [#allocation23 + $0x1], 1 }
 0x91b   :  { %2403 = vsyncpa [#allocation5], 1 }
 0x91c   :  { %2405 = vsyncpa [#allocation5 + $0x1], 1 }

</bundles_post_ra>
